<compile_context>
chip_gen: v7x
topology: tpu7x:2x2x1
jax: 0.10.0
libtpu: 0.0.40
codegen_flags: <defaults>
</compile_context>

<pallas_src>
import jax
import jax.numpy as jnp
from jax.experimental import pallas as pl
from jax.experimental.pallas import tpu as pltpu

EMBEDDING_SIZE = 64   # matches the module-level `embedding_size`
OUTPUTS = 4           # number of actions for the head
BN_EPS = 1e-5
KSIZE = 5
STRIDE = 2


def _conv_out(size, k=KSIZE, s=STRIDE):
    return (size - (k - 1) - 1) // s + 1


L0 = EMBEDDING_SIZE
T1 = _conv_out(L0)     # 30
T2 = _conv_out(T1)     # 13
T3 = _conv_out(T2)     # 5
C1, C2, C3 = 16, 32, 32
LINEAR_IN = T3 * C3    # 160


# ----------------------------------------------------------------------------
# Fused kernel: whole DQN forward for a B_TILE-sized batch block per grid step.
# Activation layout per layer: (B_TILE, T*C) with flat index t*C + c (lane-dense).
# ----------------------------------------------------------------------------
def _dqn_fused_kernel(x_ref, w1_ref, b1_ref, w2_ref, b2_ref, w3_ref, b3_ref,
                      wh_ref, bh_ref, o_ref):
    x = x_ref[...]                                                   # (BT, 64)
    a1 = jnp.maximum(
        jnp.dot(x, w1_ref[...], preferred_element_type=jnp.float32)
        + b1_ref[...], 0.0)                                          # (BT, 480)
    a2 = jnp.maximum(
        jnp.dot(a1, w2_ref[...], preferred_element_type=jnp.float32)
        + b2_ref[...], 0.0)                                          # (BT, 416)
    a3 = jnp.maximum(
        jnp.dot(a2, w3_ref[...], preferred_element_type=jnp.float32)
        + b3_ref[...], 0.0)                                          # (BT, 160)
    o_ref[...] = (jnp.dot(a3, wh_ref[...], preferred_element_type=jnp.float32)
                  + bh_ref[...]).astype(o_ref.dtype)                 # (BT, 4)


def _choose_btile(B):
    bt = min(256, B)
    return max(8, ((bt + 7) // 8) * 8)


# ----------------------------------------------------------------------------
# Forward wrapper: one pallas_call for the whole network.
# ----------------------------------------------------------------------------
@jax.jit
def dqn_forward(prep, x_ncl):
    """x_ncl: (B, 1, EMBEDDING_SIZE) -- the NCL layout PyTorch's Conv1d expects."""
    B = x_ncl.shape[0]
    x = x_ncl.reshape(B, L0).astype(jnp.float32)   # Cin == 1: free metadata reshape
    bt = _choose_btile(B)
    Bp = ((B + bt - 1) // bt) * bt
    if Bp != B:
        x = jnp.pad(x, ((0, Bp - B), (0, 0)))

    vmem = pl.BlockSpec(memory_space=pltpu.MemorySpace.VMEM)   # whole-array, resident
    out = pl.pallas_call(
        _dqn_fused_kernel,
        out_shape=jax.ShapeDtypeStruct((Bp, OUTPUTS), jnp.float32),
        grid=(Bp // bt,),
        in_specs=[pl.BlockSpec((bt, L0), lambda i: (i, 0)),
                  vmem, vmem, vmem, vmem, vmem, vmem, vmem, vmem],
        out_specs=pl.BlockSpec((bt, OUTPUTS), lambda i: (i, 0)),
        compiler_params=pltpu.CompilerParams(
            dimension_semantics=("parallel",)),
    )(x, prep["W1"], prep["B1"], prep["W2"], prep["B2"],
      prep["W3"], prep["B3"], prep["WH"], prep["BH"])
    return out[:B]


# ----------------------------------------------------------------------------
# One-time parameter prep:
#  * fold eval-mode BatchNorm into conv weights/bias,
#  * expand each stride-2 conv into a banded dense matrix over (time*channel),
#  * pre-permute the head weight to undo PyTorch's (C, L) flatten order.
# ----------------------------------------------------------------------------
def prepare_params(p):
    # TODO(synk): training-mode BatchNorm (batch statistics) is not folded here;
    # this implements eval-mode running-stats semantics only.
    def fold(w, cb, g, be, m, v):
        s = g / jnp.sqrt(v + BN_EPS)                   # (Cout,)
        wt = jnp.transpose(w, (2, 1, 0)) * s           # (K, Cin, Cout) scaled
        b = ((cb - m) * s + be).reshape(1, -1)         # (1, Cout)
        return wt.astype(jnp.float32), b.astype(jnp.float32)

    def band(wt, t_in, t_out):
        # Dense banded matrix: big[tin*Cin+ci, tout*Cout+co] = wt[tin-2*tout, ci, co]
        k, cin, cout = wt.shape
        big = jnp.zeros((t_in, cin, t_out, cout), jnp.float32)
        for t in range(t_out):
            big = big.at[STRIDE * t:STRIDE * t + k, :, t, :].set(wt)
        return big.reshape(t_in * cin, t_out * cout)

    w1t, b1 = fold(p["w1"], p["cb1"], p["g1"], p["be1"], p["m1"], p["v1"])
    w2t, b2 = fold(p["w2"], p["cb2"], p["g2"], p["be2"], p["m2"], p["v2"])
    w3t, b3 = fold(p["w3"], p["cb3"], p["g3"], p["be3"], p["m3"], p["v3"])

    W1 = band(w1t, L0, T1)             # (64,  480)
    W2 = band(w2t, T1, T2)             # (480, 416)
    W3 = band(w3t, T2, T3)             # (416, 160)
    B1 = jnp.tile(b1, (1, T1))         # (1, 480) -- index t*C1 + c
    B2 = jnp.tile(b2, (1, T2))         # (1, 416)
    B3 = jnp.tile(b3, (1, T3))         # (1, 160)
    # head weight (OUTPUTS, C3*T3) indexed [n, c*T3 + t] -> WH[t*C3 + c, n]
    WH = jnp.transpose(p["w_head"].reshape(OUTPUTS, C3, T3),
                       (2, 1, 0)).reshape(LINEAR_IN, OUTPUTS).astype(jnp.float32)
    BH = p["b_head"].reshape(1, OUTPUTS).astype(jnp.float32)
    return {"W1": W1, "B1": B1, "W2": W2, "B2": B2,
            "W3": W3, "B3": B3, "WH": WH, "BH": BH}


# ----------------------------------------------------------------------------
# Pure-JAX reference (lax.conv) for a correctness check.
# ----------------------------------------------------------------------------
def _ref_forward(params, x_ncl):
    def conv_bn_relu(x, w, cb, g, be, m, v):
        y = jax.lax.conv_general_dilated(
            x, w, window_strides=(STRIDE,), padding="VALID",
            dimension_numbers=("NCH", "OIH", "NCH"))
        y = y + cb[None, :, None]
        y = (y - m[None, :, None]) / jnp.sqrt(v[None, :, None] + BN_EPS)
        y = y * g[None, :, None] + be[None, :, None]
        return jnp.maximum(y, 0.0)

    x = conv_bn_relu(x_ncl, params["w1"], params["cb1"],
                     params["g1"], params["be1"], params["m1"], params["v1"])
    x = conv_bn_relu(x, params["w2"], params["cb2"],
                     params["g2"], params["be2"], params["m2"], params["v2"])
    x = conv_bn_relu(x, params["w3"], params["cb3"],
                     params["g3"], params["be3"], params["m3"], params["v3"])
    x = x.reshape(x.shape[0], -1)
    return x @ params["w_head"].T + params["b_head"]


# ----------------------------------------------------------------------------
# Deterministic parameter init (shapes from DQN.__init__ with embedding_size=64).
# ----------------------------------------------------------------------------
def init_params(key, outputs=OUTPUTS):
    ks = jax.random.split(key, 8)
    p = {
        "w1": 0.1 * jax.random.normal(ks[0], (C1, 1, KSIZE), jnp.float32),
        "cb1": 0.1 * jax.random.normal(ks[1], (C1,), jnp.float32),
        "w2": 0.1 * jax.random.normal(ks[2], (C2, C1, KSIZE), jnp.float32),
        "cb2": 0.1 * jax.random.normal(ks[3], (C2,), jnp.float32),
        "w3": 0.1 * jax.random.normal(ks[4], (C3, C2, KSIZE), jnp.float32),
        "cb3": 0.1 * jax.random.normal(ks[5], (C3,), jnp.float32),
        "w_head": 0.1 * jax.random.normal(ks[6], (outputs, LINEAR_IN), jnp.float32),
        "b_head": 0.1 * jax.random.normal(ks[7], (outputs,), jnp.float32),
    }
    # BatchNorm1d params at PyTorch init (eval-mode / running stats)
    for i, c in zip((1, 2, 3), (C1, C2, C3)):
        p[f"g{i}"] = jnp.ones((c,), jnp.float32)
        p[f"be{i}"] = jnp.zeros((c,), jnp.float32)
        p[f"m{i}"] = jnp.zeros((c,), jnp.float32)
        p[f"v{i}"] = jnp.ones((c,), jnp.float32)
    return p


if __name__ == "__main__":
    key = jax.random.PRNGKey(0)
    k_param, k_x = jax.random.split(key)
    params = init_params(k_param)
    prep = prepare_params(params)

    # Small primary check (batch=2) + a batch-blocked check (grid > 1, padding).
    for batch in (2, 384):
        kx = jax.random.fold_in(k_x, batch)
        x = jax.random.normal(kx, (batch, 1, EMBEDDING_SIZE), jnp.float32)
        out = jax.block_until_ready(dqn_forward(prep, x))
        ref = jax.block_until_ready(_ref_forward(params, x))
        assert out.shape == (batch, OUTPUTS), out.shape
        assert jnp.allclose(out, ref, rtol=1e-4, atol=1e-4), (
            batch, float(jnp.max(jnp.abs(out - ref))))
    print("KERNEL_OK")
</pallas_src>

<mosaic_0001>
module attributes {stable_mosaic.version = 11 : i64} {
  func.func @_dqn_fused_kernel(%arg0: i32, %arg1: memref<8x64xf32, #tpu.memory_space<vmem>>, %arg2: memref<64x480xf32, #tpu.memory_space<vmem>>, %arg3: memref<1x480xf32, #tpu.memory_space<vmem>>, %arg4: memref<480x416xf32, #tpu.memory_space<vmem>>, %arg5: memref<1x416xf32, #tpu.memory_space<vmem>>, %arg6: memref<416x160xf32, #tpu.memory_space<vmem>>, %arg7: memref<1x160xf32, #tpu.memory_space<vmem>>, %arg8: memref<160x4xf32, #tpu.memory_space<vmem>>, %arg9: memref<1x4xf32, #tpu.memory_space<vmem>>, %arg10: memref<8x4xf32, #tpu.memory_space<vmem>>) attributes {dimension_semantics = [#tpu.dimension_semantics<parallel>], iteration_bounds = array<i64: 1>, scalar_prefetch = 0 : i64, scratch_operands = 0 : i64, tpu.core_type = #tpu.core_type<tc>, window_params = [{transform_indices = @transform_0, window_bounds = array<i64: 8, 64>}, {pipeline_mode = #tpu.pipeline_mode<synchronous>, transform_indices = @transform_1, window_bounds = array<i64: 64, 480>}, {pipeline_mode = #tpu.pipeline_mode<synchronous>, transform_indices = @transform_2, window_bounds = array<i64: 1, 480>}, {pipeline_mode = #tpu.pipeline_mode<synchronous>, transform_indices = @transform_3, window_bounds = array<i64: 480, 416>}, {pipeline_mode = #tpu.pipeline_mode<synchronous>, transform_indices = @transform_4, window_bounds = array<i64: 1, 416>}, {pipeline_mode = #tpu.pipeline_mode<synchronous>, transform_indices = @transform_5, window_bounds = array<i64: 416, 160>}, {pipeline_mode = #tpu.pipeline_mode<synchronous>, transform_indices = @transform_6, window_bounds = array<i64: 1, 160>}, {pipeline_mode = #tpu.pipeline_mode<synchronous>, transform_indices = @transform_7, window_bounds = array<i64: 160, 4>}, {pipeline_mode = #tpu.pipeline_mode<synchronous>, transform_indices = @transform_8, window_bounds = array<i64: 1, 4>}, {transform_indices = @transform_9, window_bounds = array<i64: 8, 4>}]} {
    %c0 = arith.constant 0 : index
    %c0_0 = arith.constant 0 : index
    %0 = vector.load %arg1[%c0, %c0_0] : memref<8x64xf32, #tpu.memory_space<vmem>>, vector<8x64xf32>
    %c0_1 = arith.constant 0 : index
    %c0_2 = arith.constant 0 : index
    %1 = vector.load %arg2[%c0_1, %c0_2] : memref<64x480xf32, #tpu.memory_space<vmem>>, vector<64x480xf32>
    %cst = arith.constant dense<0.000000e+00> : vector<8x480xf32>
    %2 = tpu.matmul %0, %1, %cst {dimension_numbers = #tpu.dot_dimension_numbers<[1], [0], [0], [1], [0, 0, 1, 1], [], []>} : vector<8x64xf32>, vector<64x480xf32>, vector<8x480xf32> -> vector<8x480xf32>
    %c0_3 = arith.constant 0 : index
    %c0_4 = arith.constant 0 : index
    %3 = vector.load %arg3[%c0_3, %c0_4] : memref<1x480xf32, #tpu.memory_space<vmem>>, vector<1x480xf32>
    %4 = vector.broadcast %3 : vector<1x480xf32> to vector<8x480xf32>
    %5 = arith.addf %2, %4 : vector<8x480xf32>
    %cst_5 = arith.constant 0.000000e+00 : f32
    %6 = vector.broadcast %cst_5 : f32 to vector<8x480xf32>
    %7 = arith.maximumf %5, %6 : vector<8x480xf32>
    %c0_6 = arith.constant 0 : index
    %c0_7 = arith.constant 0 : index
    %8 = vector.load %arg4[%c0_6, %c0_7] : memref<480x416xf32, #tpu.memory_space<vmem>>, vector<480x416xf32>
    %cst_8 = arith.constant dense<0.000000e+00> : vector<8x416xf32>
    %9 = tpu.matmul %7, %8, %cst_8 {dimension_numbers = #tpu.dot_dimension_numbers<[1], [0], [0], [1], [0, 0, 1, 1], [], []>} : vector<8x480xf32>, vector<480x416xf32>, vector<8x416xf32> -> vector<8x416xf32>
    %c0_9 = arith.constant 0 : index
    %c0_10 = arith.constant 0 : index
    %10 = vector.load %arg5[%c0_9, %c0_10] : memref<1x416xf32, #tpu.memory_space<vmem>>, vector<1x416xf32>
    %11 = vector.broadcast %10 : vector<1x416xf32> to vector<8x416xf32>
    %12 = arith.addf %9, %11 : vector<8x416xf32>
    %cst_11 = arith.constant 0.000000e+00 : f32
    %13 = vector.broadcast %cst_11 : f32 to vector<8x416xf32>
    %14 = arith.maximumf %12, %13 : vector<8x416xf32>
    %c0_12 = arith.constant 0 : index
    %c0_13 = arith.constant 0 : index
    %15 = vector.load %arg6[%c0_12, %c0_13] : memref<416x160xf32, #tpu.memory_space<vmem>>, vector<416x160xf32>
    %cst_14 = arith.constant dense<0.000000e+00> : vector<8x160xf32>
    %16 = tpu.matmul %14, %15, %cst_14 {dimension_numbers = #tpu.dot_dimension_numbers<[1], [0], [0], [1], [0, 0, 1, 1], [], []>} : vector<8x416xf32>, vector<416x160xf32>, vector<8x160xf32> -> vector<8x160xf32>
    %c0_15 = arith.constant 0 : index
    %c0_16 = arith.constant 0 : index
    %17 = vector.load %arg7[%c0_15, %c0_16] : memref<1x160xf32, #tpu.memory_space<vmem>>, vector<1x160xf32>
    %18 = vector.broadcast %17 : vector<1x160xf32> to vector<8x160xf32>
    %19 = arith.addf %16, %18 : vector<8x160xf32>
    %cst_17 = arith.constant 0.000000e+00 : f32
    %20 = vector.broadcast %cst_17 : f32 to vector<8x160xf32>
    %21 = arith.maximumf %19, %20 : vector<8x160xf32>
    %c0_18 = arith.constant 0 : index
    %c0_19 = arith.constant 0 : index
    %22 = vector.load %arg8[%c0_18, %c0_19] : memref<160x4xf32, #tpu.memory_space<vmem>>, vector<160x4xf32>
    %cst_20 = arith.constant dense<0.000000e+00> : vector<8x4xf32>
    %23 = tpu.matmul %21, %22, %cst_20 {dimension_numbers = #tpu.dot_dimension_numbers<[1], [0], [0], [1], [0, 0, 1, 1], [], []>} : vector<8x160xf32>, vector<160x4xf32>, vector<8x4xf32> -> vector<8x4xf32>
    %c0_21 = arith.constant 0 : index
    %c0_22 = arith.constant 0 : index
    %24 = vector.load %arg9[%c0_21, %c0_22] : memref<1x4xf32, #tpu.memory_space<vmem>>, vector<1x4xf32>
    %25 = vector.broadcast %24 : vector<1x4xf32> to vector<8x4xf32>
    %26 = arith.addf %23, %25 : vector<8x4xf32>
    %c0_23 = arith.constant 0 : index
    %c0_24 = arith.constant 0 : index
    %27 = vector.load %arg10[%c0_23, %c0_24] : memref<8x4xf32, #tpu.memory_space<vmem>>, vector<8x4xf32>
    tpu.vector_store %arg10[%c0_23, %c0_24], %26 {strides = array<i32>} : memref<8x4xf32, #tpu.memory_space<vmem>>, vector<8x4xf32>,
    return
  }
  func.func @transform_0(%arg0: i32) -> (i32, i32) {
    %c0_i32 = arith.constant 0 : i32
    %c0_i32_0 = arith.constant 0 : i32
    return %arg0, %c0_i32 : i32, i32
  }
  func.func @transform_1(%arg0: i32) -> (i32, i32) {
    %c0_i32 = arith.constant 0 : i32
    %c0_i32_0 = arith.constant 0 : i32
    %c0_i32_1 = arith.constant 0 : i32
    return %c0_i32, %c0_i32_0 : i32, i32
  }
  func.func @transform_2(%arg0: i32) -> (i32, i32) {
    %c0_i32 = arith.constant 0 : i32
    %c0_i32_0 = arith.constant 0 : i32
    %c0_i32_1 = arith.constant 0 : i32
    return %c0_i32, %c0_i32_0 : i32, i32
  }
  func.func @transform_3(%arg0: i32) -> (i32, i32) {
    %c0_i32 = arith.constant 0 : i32
    %c0_i32_0 = arith.constant 0 : i32
    %c0_i32_1 = arith.constant 0 : i32
    return %c0_i32, %c0_i32_0 : i32, i32
  }
  func.func @transform_4(%arg0: i32) -> (i32, i32) {
    %c0_i32 = arith.constant 0 : i32
    %c0_i32_0 = arith.constant 0 : i32
    %c0_i32_1 = arith.constant 0 : i32
    return %c0_i32, %c0_i32_0 : i32, i32
  }
  func.func @transform_5(%arg0: i32) -> (i32, i32) {
    %c0_i32 = arith.constant 0 : i32
    %c0_i32_0 = arith.constant 0 : i32
    %c0_i32_1 = arith.constant 0 : i32
    return %c0_i32, %c0_i32_0 : i32, i32
  }
  func.func @transform_6(%arg0: i32) -> (i32, i32) {
    %c0_i32 = arith.constant 0 : i32
    %c0_i32_0 = arith.constant 0 : i32
    %c0_i32_1 = arith.constant 0 : i32
    return %c0_i32, %c0_i32_0 : i32, i32
  }
  func.func @transform_7(%arg0: i32) -> (i32, i32) {
    %c0_i32 = arith.constant 0 : i32
    %c0_i32_0 = arith.constant 0 : i32
    %c0_i32_1 = arith.constant 0 : i32
    return %c0_i32, %c0_i32_0 : i32, i32
  }
  func.func @transform_8(%arg0: i32) -> (i32, i32) {
    %c0_i32 = arith.constant 0 : i32
    %c0_i32_0 = arith.constant 0 : i32
    %c0_i32_1 = arith.constant 0 : i32
    return %c0_i32, %c0_i32_0 : i32, i32
  }
  func.func @transform_9(%arg0: i32) -> (i32, i32) {
    %c0_i32 = arith.constant 0 : i32
    %c0_i32_0 = arith.constant 0 : i32
    return %arg0, %c0_i32 : i32, i32
  }
}

</mosaic_0001>

<bundles_post_ra>
// kernel: dqn_forward.1
= control target key start
LH: loop header
LB: loop body
LE: loop exit
PB: predicated region body
PF: predicated region fallthrough
CT: control target
= control target key end

     0   :  { %v1588_v3 = vmov 0.0   ;;  %vm87_vm0 = vcmask 523264   ;;  %vm499_vm1 = vcmask 785408   ;;  %vm907_vm2 = vcmask 261120   ;;  %s2895_s1 = inlined_call_operand.vmem [shape: f32[64,480], index: 1, kind: input, shape index: {}]   ;;  %s2896_s3 = inlined_call_operand.vmem [shape: f32[480,416], index: 3, kind: input, shape index: {}]   ;;  %s2897_s0 = inlined_call_operand.vmem [shape: f32[8,64], index: 0, kind: input, shape index: {}]   ;;  %s2898_s2 = inlined_call_operand.vmem [shape: f32[1,480], index: 2, kind: input, shape index: {}]   ;;  %s2899_s5 = inlined_call_operand.vmem [shape: f32[416,160], index: 5, kind: input, shape index: {}]   ;;  %s2900_s4 = inlined_call_operand.vmem [shape: f32[1,416], index: 4, kind: input, shape index: {}]   ;;  %s2901_s7 = inlined_call_operand.vmem [shape: f32[160,4], index: 7, kind: input, shape index: {}]   ;;  %s2902_s6 = inlined_call_operand.vmem [shape: f32[1,160], index: 6, kind: input, shape index: {}]   ;;  %s2903_s8 = inlined_call_operand.vmem [shape: f32[1,4], index: 8, kind: input, shape index: {}]   ;;  %s2904_s9 = inlined_call_operand.vmem [shape: f32[8,4], index: 9, kind: output, shape index: {}]  }
   0x1   :  { %v34_v0 = vld [vmem:[%s2895_s1 + $0x8] sm:$0xff]  ;;  %v33_v2 = vld [vmem:[%s2895_s1] sm:$0xff]  ;;  %155 = vmatprep.mubr.f32.mxu0 %v1588_v3  ;;  %226 = vmatprep.mubr.f32.mxu1 %v1588_v3  ;;  %v36_v20 = vld [vmem:[%s2895_s1 + $0x18] sm:$0xff]  ;;  %vm1155_vm3 = vcmask 31744  }
   0x2   :  { %v38_v1 = vld [vmem:[%s2895_s1 + $0x28] sm:$0xff]  ;;  %v37_v5 = vld [vmem:[%s2895_s1 + $0x20] sm:$0xff]  ;;  %v40_v21 = vld [vmem:[%s2895_s1 + $0x38] sm:$0xff] }
   0x3   :  { %v1168_v4 = vpack.c.bf16 %v38_v1, %v34_v0  ;;  %v42_v6 = vld [vmem:[%s2895_s1 + $0x48] sm:$0xff]  ;;  %v1170_v8 = vpack.c.bf16 %v37_v5, %v33_v2  ;;  %v41_v10 = vld [vmem:[%s2895_s1 + $0x40] sm:$0xff]  ;;  %v35_v22 = vld [vmem:[%s2895_s1 + $0x10] sm:$0xff]  ;;  %v1184_v24 = vpack.c.bf16 %v40_v21, %v36_v20 }
   0x4   :  { %v46_v7 = vld [vmem:[%s2895_s1 + $0x68] sm:$0xff]  ;;  %v45_v11 = vld [vmem:[%s2895_s1 + $0x60] sm:$0xff]  ;;  %v39_v23 = vld [vmem:[%s2895_s1 + $0x30] sm:$0xff] }
   0x5   :  { %v1172_v9 = vpack.c.bf16 %v46_v7, %v42_v6  ;;  %v50_v12 = vld [vmem:[%s2895_s1 + $0x88] sm:$0xff]  ;;  %1169 = vmatprep.subr.bf16.mxu0 %v1168_v4  ;;  %v1174_v14 = vpack.c.bf16 %v45_v11, %v41_v10  ;;  %v49_v15 = vld [vmem:[%s2895_s1 + $0x80] sm:$0xff]  ;;  %v1186_v25 = vpack.c.bf16 %v39_v23, %v35_v22  ;;  %v44_v26 = vld [vmem:[%s2895_s1 + $0x58] sm:$0xff]  ;;  %1185 = vmatprep.subr.bf16.mxu1 %v1184_v24 }
   0x6   :  { %v54_v13 = vld [vmem:[%s2895_s1 + $0xa8] sm:$0xff]  ;;  %1171 = vmatpush1.bf16.msra.mxu0 %v1170_v8  ;;  %v53_v16 = vld [vmem:[%s2895_s1 + $0xa0] sm:$0xff]  ;;  %v48_v27 = vld [vmem:[%s2895_s1 + $0x78] sm:$0xff] }
   0x7   :  { %1173 = vmatprep.subr.bf16.mxu0 %v1172_v9  ;;  %v1176_v17 = vpack.c.bf16 %v54_v13, %v50_v12  ;;  %v58_v18 = vld [vmem:[%s2895_s1 + $0xc8] sm:$0xff]  ;;  %v43_v28 = vld [vmem:[%s2895_s1 + $0x50] sm:$0xff]  ;;  %v1178_v29 = vpack.c.bf16 %v53_v16, %v49_v15  ;;  %v1188_v30 = vpack.c.bf16 %v48_v27, %v44_v26  ;;  %v52_v32 = vld [vmem:[%s2895_s1 + $0x98] sm:$0xff]  ;;  %1187 = vmatpush1.bf16.msra.mxu1 %v1186_v25 }
   0x8   :  { %v62_v19 = vld [vmem:[%s2895_s1 + $0xe8] sm:$0xff]  ;;  %v47_v31 = vld [vmem:[%s2895_s1 + $0x70] sm:$0xff]  ;;  %v56_v33 = vld [vmem:[%s2895_s1 + $0xb8] sm:$0xff] }
   0x9   :  { %v1180_v34 = vpack.c.bf16 %v62_v19, %v58_v18  ;;  %v57_v35 = vld [vmem:[%s2895_s1 + $0xc0] sm:$0xff]  ;;  %v1190_v37 = vpack.c.bf16 %v47_v31, %v43_v28  ;;  %v51_v38 = vld [vmem:[%s2895_s1 + $0x90] sm:$0xff]  ;;  %1189 = vmatprep.subr.bf16.mxu1 %v1188_v30  ;;  %v1192_v39 = vpack.c.bf16 %v56_v33, %v52_v32  ;;  %v238_v41 = vld [vmem:[%s2896_s3 + $0x8] sm:$0xff] }
   0xa   :  { %1175 = vmatpush1.bf16.msra.mxu0 %v1174_v14  ;;  %v61_v36 = vld [vmem:[%s2895_s1 + $0xe0] sm:$0xff]  ;;  %v55_v40 = vld [vmem:[%s2895_s1 + $0xb0] sm:$0xff]  ;;  %v242_v42 = vld [vmem:[%s2896_s3 + $0x28] sm:$0xff] }
   0xb   :  { %1177 = vmatprep.subr.bf16.mxu0 %v1176_v17  ;;  %v1182_v43 = vpack.c.bf16 %v61_v36, %v57_v35  ;;  %v60_v44 = vld [vmem:[%s2895_s1 + $0xd8] sm:$0xff]  ;;  %v1200_v46 = vpack.c.bf16 %v242_v42, %v238_v41  ;;  %v237_v47 = vld [vmem:[%s2896_s3] sm:$0xff]  ;;  %1191 = vmatpush1.bf16.msra.mxu1 %v1190_v37  ;;  %v1194_v49 = vpack.c.bf16 %v55_v40, %v51_v38  ;;  %v246_v50 = vld [vmem:[%s2896_s3 + $0x48] sm:$0xff] }
   0xc   :  { %v64_v45 = vld [vmem:[%s2895_s1 + $0xf8] sm:$0xff]  ;;  %v241_v48 = vld [vmem:[%s2896_s3 + $0x20] sm:$0xff]  ;;  %v250_v51 = vld [vmem:[%s2896_s3 + $0x68] sm:$0xff]  ;;  %1193 = vmatprep.subr.bf16.mxu1 %v1192_v39 }
   0xd   :  { %v1196_v52 = vpack.c.bf16 %v64_v45, %v60_v44  ;;  %v59_v53 = vld [vmem:[%s2895_s1 + $0xd0] sm:$0xff]  ;;  %v32_v55 = vld [vmem:[%s2897_s0] sm:$0xff]  ;;  %v240_v56 = vld [vmem:[%s2896_s3 + $0x18] sm:$0xff]  ;;  %v1202_v58 = vpack.c.bf16 %v241_v48, %v237_v47  ;;  %v1204_v59 = vpack.c.bf16 %v250_v51, %v246_v50 }
   0xe   :  { %1179 = vmatpush1.bf16.msra.mxu0 %v1178_v29  ;;  %v63_v54 = vld [vmem:[%s2895_s1 + $0xf0] sm:$0xff]  ;;  %v244_v57 = vld [vmem:[%s2896_s3 + $0x38] sm:$0xff]  ;;  %v245_v60 = vld [vmem:[%s2896_s3 + $0x40] sm:$0xff] }
   0xf   :  { %1181 = vmatprep.subr.bf16.mxu0 %v1180_v34  ;;  %v249_v61 = vld [vmem:[%s2896_s3 + $0x60] sm:$0xff]  ;;  %1195 = vmatpush1.bf16.msra.mxu1 %v1194_v49  ;;  %v1198_v62 = vpack.c.bf16 %v63_v54, %v59_v53  ;;  %v254_v63 = vld [vmem:[%s2896_s3 + $0x88] sm:$0xff]  ;;  %v1320_v1 = vpack.c.bf16 %v244_v57, %v240_v56  ;;  %v239_v2 = vld [vmem:[%s2896_s3 + $0x10] sm:$0xff] }
  0x10   :  { %v258_v0 = vld [vmem:[%s2896_s3 + $0xa8] sm:$0xff]  ;;  %1197 = vmatprep.subr.bf16.mxu1 %v1196_v52  ;;  %v243_v3 = vld [vmem:[%s2896_s3 + $0x30] sm:$0xff]  ;;  %v248_v4 = vld [vmem:[%s2896_s3 + $0x58] sm:$0xff]  ;;  %v1206_v6 = vpack.c.bf16 %v249_v61, %v245_v60 }
  0x11   :  { %v252_v5 = vld [vmem:[%s2896_s3 + $0x78] sm:$0xff]  ;;  %v1208_v7 = vpack.c.bf16 %v258_v0, %v254_v63  ;;  %v253_v8 = vld [vmem:[%s2896_s3 + $0x80] sm:$0xff]  ;;  %v1322_v10 = vpack.c.bf16 %v243_v3, %v239_v2  ;;  %v262_v11 = vld [vmem:[%s2896_s3 + $0xc8] sm:$0xff] }
  0x12   :  { %1183 = vmatpush1.bf16.msra.mxu0 %v1182_v43  ;;  %v257_v9 = vld [vmem:[%s2896_s3 + $0xa0] sm:$0xff]  ;;  %v266_v12 = vld [vmem:[%s2896_s3 + $0xe8] sm:$0xff]  ;;  %v1324_v13 = vpack.c.bf16 %v252_v5, %v248_v4  ;;  %v247_v14 = vld [vmem:[%s2896_s3 + $0x50] sm:$0xff] }
  0x13   :  { %1201 = vmatprep.subr.bf16.mxu0 %v1200_v46  ;;  %1199 = vmatpush1.bf16.msra.mxu1 %v1198_v62  ;;  %v251_v15 = vld [vmem:[%s2896_s3 + $0x70] sm:$0xff]  ;;  %v256_v16 = vld [vmem:[%s2896_s3 + $0x98] sm:$0xff]  ;;  %v1210_v18 = vpack.c.bf16 %v257_v9, %v253_v8  ;;  %v1212_v19 = vpack.c.bf16 %v266_v12, %v262_v11  ;;  %v261_v20 = vld [vmem:[%s2896_s3 + $0xc0] sm:$0xff] }
  0x14   :  { %1321 = vmatprep.subr.bf16.mxu1 %v1320_v1  ;;  %v260_v17 = vld [vmem:[%s2896_s3 + $0xb8] sm:$0xff]  ;;  %v265_v21 = vld [vmem:[%s2896_s3 + $0xe0] sm:$0xff]  ;;  %v1326_v22 = vpack.c.bf16 %v251_v15, %v247_v14  ;;  %v270_v23 = vld [vmem:[%s2896_s3 + $0x108] sm:$0xff] }
  0x15   :  { %1161 = vmatmul.mubr.msk.f32.vlgmr.msra.gmra.mrb[0].mxu0 %vm87_vm0, %v32_v55  ;;  %v274_v24 = vld [vmem:[%s2896_s3 + $0x128] sm:$0xff]  ;;  %v1328_v25 = vpack.c.bf16 %v260_v17, %v256_v16  ;;  %v255_v26 = vld [vmem:[%s2896_s3 + $0x90] sm:$0xff]  ;;  %v264_v28 = vld [vmem:[%s2896_s3 + $0xd8] sm:$0xff]  ;;  %v1214_v30 = vpack.c.bf16 %v265_v21, %v261_v20 }
  0x16   :  { %1203 = vmatpush1.bf16.msra.mxu0 %v1202_v58  ;;  %1162 = vmatmul.mubr.msk.f32.vlgmr.msra.gmra.mrb[0].mxu1 %vm87_vm0, %v32_v55  ;;  %v259_v27 = vld [vmem:[%s2896_s3 + $0xb0] sm:$0xff]  ;;  %v268_v29 = vld [vmem:[%s2896_s3 + $0xf8] sm:$0xff]  ;;  %v1216_v31 = vpack.c.bf16 %v274_v24, %v270_v23  ;;  %v269_v32 = vld [vmem:[%s2896_s3 + $0x100] sm:$0xff] }
  0x17   :  { %1205 = vmatprep.subr.bf16.mxu0 %v1204_v59  ;;  %1323 = vmatpush1.bf16.msra.mxu1 %v1322_v10  ;;  %v273_v33 = vld [vmem:[%s2896_s3 + $0x120] sm:$0xff]  ;;  %v1330_v34 = vpack.c.bf16 %v259_v27, %v255_v26  ;;  %v278_v35 = vld [vmem:[%s2896_s3 + $0x148] sm:$0xff]  ;;  %v1332_v37 = vpack.c.bf16 %v268_v29, %v264_v28  ;;  %v263_v38 = vld [vmem:[%s2896_s3 + $0xd0] sm:$0xff] }
  0x18   :  { %1325 = vmatprep.subr.bf16.mxu1 %v1324_v13  ;;  %v282_v36 = vld [vmem:[%s2896_s3 + $0x168] sm:$0xff]  ;;  %v267_v39 = vld [vmem:[%s2896_s3 + $0xf0] sm:$0xff]  ;;  %v272_v40 = vld [vmem:[%s2896_s3 + $0x118] sm:$0xff]  ;;  %v1218_v42 = vpack.c.bf16 %v273_v33, %v269_v32 }
  0x19   :  { %v276_v41 = vld [vmem:[%s2896_s3 + $0x138] sm:$0xff]  ;;  %v1220_v43 = vpack.c.bf16 %v282_v36, %v278_v35  ;;  %v277_v44 = vld [vmem:[%s2896_s3 + $0x140] sm:$0xff]  ;;  %v1334_v46 = vpack.c.bf16 %v267_v39, %v263_v38  ;;  %v286_v47 = vld [vmem:[%s2896_s3 + $0x188] sm:$0xff] }
  0x1a   :  { %1207 = vmatpush1.bf16.msra.mxu0 %v1206_v6  ;;  %v281_v45 = vld [vmem:[%s2896_s3 + $0x160] sm:$0xff]  ;;  %v290_v48 = vld [vmem:[%s2896_s3 + $0x1a8] sm:$0xff]  ;;  %v1336_v49 = vpack.c.bf16 %v276_v41, %v272_v40  ;;  %v271_v50 = vld [vmem:[%s2896_s3 + $0x110] sm:$0xff] }
  0x1b   :  { %1209 = vmatprep.subr.bf16.mxu0 %v1208_v7  ;;  %1327 = vmatpush1.bf16.msra.mxu1 %v1326_v22  ;;  %v275_v51 = vld [vmem:[%s2896_s3 + $0x130] sm:$0xff]  ;;  %v280_v52 = vld [vmem:[%s2896_s3 + $0x158] sm:$0xff]  ;;  %v1222_v54 = vpack.c.bf16 %v281_v45, %v277_v44  ;;  %v1224_v55 = vpack.c.bf16 %v290_v48, %v286_v47  ;;  %v285_v56 = vld [vmem:[%s2896_s3 + $0x180] sm:$0xff] }
  0x1c   :  { %1329 = vmatprep.subr.bf16.mxu1 %v1328_v25  ;;  %v284_v53 = vld [vmem:[%s2896_s3 + $0x178] sm:$0xff]  ;;  %v289_v57 = vld [vmem:[%s2896_s3 + $0x1a0] sm:$0xff]  ;;  %v1338_v58 = vpack.c.bf16 %v275_v51, %v271_v50  ;;  %v294_v59 = vld [vmem:[%s2896_s3 + $0x1c8] sm:$0xff] }
  0x1d   :  { %v298_v60 = vld [vmem:[%s2896_s3 + $0x1e8] sm:$0xff]  ;;  %v1340_v61 = vpack.c.bf16 %v284_v53, %v280_v52  ;;  %v279_v62 = vld [vmem:[%s2896_s3 + $0x150] sm:$0xff]  ;;  %v288_v0 = vld [vmem:[%s2896_s3 + $0x198] sm:$0xff]  ;;  %v1226_v2 = vpack.c.bf16 %v289_v57, %v285_v56 }
  0x1e   :  { %1211 = vmatpush1.bf16.msra.mxu0 %v1210_v18  ;;  %v283_v63 = vld [vmem:[%s2896_s3 + $0x170] sm:$0xff]  ;;  %v292_v1 = vld [vmem:[%s2896_s3 + $0x1b8] sm:$0xff]  ;;  %v1228_v3 = vpack.c.bf16 %v298_v60, %v294_v59  ;;  %v293_v4 = vld [vmem:[%s2896_s3 + $0x1c0] sm:$0xff] }
  0x1f   :  { %1213 = vmatprep.subr.bf16.mxu0 %v1212_v19  ;;  %1331 = vmatpush1.bf16.msra.mxu1 %v1330_v34  ;;  %v297_v5 = vld [vmem:[%s2896_s3 + $0x1e0] sm:$0xff]  ;;  %v1342_v6 = vpack.c.bf16 %v283_v63, %v279_v62  ;;  %v302_v7 = vld [vmem:[%s2896_s3 + $0x208] sm:$0xff]  ;;  %v1344_v9 = vpack.c.bf16 %v292_v1, %v288_v0  ;;  %v287_v10 = vld [vmem:[%s2896_s3 + $0x190] sm:$0xff] }
  0x20   :  { %1333 = vmatprep.subr.bf16.mxu1 %v1332_v37  ;;  %v306_v8 = vld [vmem:[%s2896_s3 + $0x228] sm:$0xff]  ;;  %v291_v11 = vld [vmem:[%s2896_s3 + $0x1b0] sm:$0xff]  ;;  %v296_v12 = vld [vmem:[%s2896_s3 + $0x1d8] sm:$0xff]  ;;  %v1230_v14 = vpack.c.bf16 %v297_v5, %v293_v4 }
  0x21   :  { %v300_v13 = vld [vmem:[%s2896_s3 + $0x1f8] sm:$0xff]  ;;  %v1232_v15 = vpack.c.bf16 %v306_v8, %v302_v7  ;;  %v301_v16 = vld [vmem:[%s2896_s3 + $0x200] sm:$0xff]  ;;  %v1346_v18 = vpack.c.bf16 %v291_v11, %v287_v10  ;;  %v310_v19 = vld [vmem:[%s2896_s3 + $0x248] sm:$0xff] }
  0x22   :  { %1215 = vmatpush1.bf16.msra.mxu0 %v1214_v30  ;;  %v305_v17 = vld [vmem:[%s2896_s3 + $0x220] sm:$0xff]  ;;  %v314_v20 = vld [vmem:[%s2896_s3 + $0x268] sm:$0xff]  ;;  %v1348_v21 = vpack.c.bf16 %v300_v13, %v296_v12  ;;  %v295_v22 = vld [vmem:[%s2896_s3 + $0x1d0] sm:$0xff] }
  0x23   :  { %1217 = vmatprep.subr.bf16.mxu0 %v1216_v31  ;;  %1335 = vmatpush1.bf16.msra.mxu1 %v1334_v46  ;;  %v299_v23 = vld [vmem:[%s2896_s3 + $0x1f0] sm:$0xff]  ;;  %v304_v24 = vld [vmem:[%s2896_s3 + $0x218] sm:$0xff]  ;;  %v1234_v26 = vpack.c.bf16 %v305_v17, %v301_v16  ;;  %v1236_v27 = vpack.c.bf16 %v314_v20, %v310_v19  ;;  %v309_v28 = vld [vmem:[%s2896_s3 + $0x240] sm:$0xff] }
  0x24   :  { %1337 = vmatprep.subr.bf16.mxu1 %v1336_v49  ;;  %v308_v25 = vld [vmem:[%s2896_s3 + $0x238] sm:$0xff]  ;;  %v313_v29 = vld [vmem:[%s2896_s3 + $0x260] sm:$0xff]  ;;  %v1350_v30 = vpack.c.bf16 %v299_v23, %v295_v22  ;;  %v318_v31 = vld [vmem:[%s2896_s3 + $0x288] sm:$0xff] }
  0x25   :  { %v322_v32 = vld [vmem:[%s2896_s3 + $0x2a8] sm:$0xff]  ;;  %v1352_v33 = vpack.c.bf16 %v308_v25, %v304_v24  ;;  %v303_v34 = vld [vmem:[%s2896_s3 + $0x210] sm:$0xff]  ;;  %v312_v36 = vld [vmem:[%s2896_s3 + $0x258] sm:$0xff]  ;;  %v1238_v38 = vpack.c.bf16 %v313_v29, %v309_v28 }
  0x26   :  { %1219 = vmatpush1.bf16.msra.mxu0 %v1218_v42  ;;  %v307_v35 = vld [vmem:[%s2896_s3 + $0x230] sm:$0xff]  ;;  %v316_v37 = vld [vmem:[%s2896_s3 + $0x278] sm:$0xff]  ;;  %v1240_v39 = vpack.c.bf16 %v322_v32, %v318_v31  ;;  %v317_v40 = vld [vmem:[%s2896_s3 + $0x280] sm:$0xff] }
  0x27   :  { %1221 = vmatprep.subr.bf16.mxu0 %v1220_v43  ;;  %1339 = vmatpush1.bf16.msra.mxu1 %v1338_v58  ;;  %v321_v41 = vld [vmem:[%s2896_s3 + $0x2a0] sm:$0xff]  ;;  %v1354_v42 = vpack.c.bf16 %v307_v35, %v303_v34  ;;  %v326_v43 = vld [vmem:[%s2896_s3 + $0x2c8] sm:$0xff]  ;;  %v1356_v45 = vpack.c.bf16 %v316_v37, %v312_v36  ;;  %v311_v46 = vld [vmem:[%s2896_s3 + $0x250] sm:$0xff] }
  0x28   :  { %1341 = vmatprep.subr.bf16.mxu1 %v1340_v61  ;;  %v330_v44 = vld [vmem:[%s2896_s3 + $0x2e8] sm:$0xff]  ;;  %v315_v47 = vld [vmem:[%s2896_s3 + $0x270] sm:$0xff]  ;;  %v320_v48 = vld [vmem:[%s2896_s3 + $0x298] sm:$0xff]  ;;  %v1242_v50 = vpack.c.bf16 %v321_v41, %v317_v40 }
  0x29   :  { %v324_v49 = vld [vmem:[%s2896_s3 + $0x2b8] sm:$0xff]  ;;  %v1244_v51 = vpack.c.bf16 %v330_v44, %v326_v43  ;;  %v325_v52 = vld [vmem:[%s2896_s3 + $0x2c0] sm:$0xff]  ;;  %v338_v56 = vld [vmem:[%s2896_s3 + $0x328] sm:$0xff] }
  0x2a   :  { %1223 = vmatpush1.bf16.msra.mxu0 %v1222_v54  ;;  %v329_v53 = vld [vmem:[%s2896_s3 + $0x2e0] sm:$0xff]  ;;  %v1358_v54 = vpack.c.bf16 %v315_v47, %v311_v46  ;;  %v1360_v57 = vpack.c.bf16 %v324_v49, %v320_v48  ;;  %v319_v58 = vld [vmem:[%s2896_s3 + $0x290] sm:$0xff]  ;;  %v328_v60 = vld [vmem:[%s2896_s3 + $0x2d8] sm:$0xff] }
  0x2b   :  { %1225 = vmatprep.subr.bf16.mxu0 %v1224_v55  ;;  %1343 = vmatpush1.bf16.msra.mxu1 %v1342_v6  ;;  %v334_v55 = vld [vmem:[%s2896_s3 + $0x308] sm:$0xff]  ;;  %v323_v59 = vld [vmem:[%s2896_s3 + $0x2b0] sm:$0xff]  ;;  %v332_v61 = vld [vmem:[%s2896_s3 + $0x2f8] sm:$0xff]  ;;  %v1246_v62 = vpack.c.bf16 %v329_v53, %v325_v52 }
  0x2c   :  { %1345 = vmatprep.subr.bf16.mxu1 %v1344_v9  ;;  %v1248_v63 = vpack.c.bf16 %v338_v56, %v334_v55  ;;  %v333_v0 = vld [vmem:[%s2896_s3 + $0x300] sm:$0xff]  ;;  %v346_v4 = vld [vmem:[%s2896_s3 + $0x368] sm:$0xff]  ;;  %v1364_v5 = vpack.c.bf16 %v332_v61, %v328_v60  ;;  %v327_v6 = vld [vmem:[%s2896_s3 + $0x2d0] sm:$0xff]  ;;  %v67_v56 = vlaneseq }
  0x2d   :  { %v337_v1 = vld [vmem:[%s2896_s3 + $0x320] sm:$0xff]  ;;  %v331_v7 = vld [vmem:[%s2896_s3 + $0x2f0] sm:$0xff]  ;;  %v336_v8 = vld [vmem:[%s2896_s3 + $0x318] sm:$0xff] }
  0x2e   :  { %1227 = vmatpush1.bf16.msra.mxu0 %v1226_v2  ;;  %v1362_v2 = vpack.c.bf16 %v323_v59, %v319_v58  ;;  %v340_v9 = vld [vmem:[%s2896_s3 + $0x338] sm:$0xff]  ;;  %v1250_v10 = vpack.c.bf16 %v337_v1, %v333_v0  ;;  %v341_v12 = vld [vmem:[%s2896_s3 + $0x340] sm:$0xff]  ;;  %v354_v16 = vld [vmem:[%s2896_s3 + $0x3a8] sm:$0xff] }
  0x2f   :  { %1229 = vmatprep.subr.bf16.mxu0 %v1228_v3  ;;  %1347 = vmatpush1.bf16.msra.mxu1 %v1346_v18  ;;  %v342_v3 = vld [vmem:[%s2896_s3 + $0x348] sm:$0xff]  ;;  %v345_v13 = vld [vmem:[%s2896_s3 + $0x360] sm:$0xff]  ;;  %v1368_v17 = vpack.c.bf16 %v340_v9, %v336_v8  ;;  %v335_v18 = vld [vmem:[%s2896_s3 + $0x310] sm:$0xff] }
  0x30   :  { %1349 = vmatprep.subr.bf16.mxu1 %v1348_v21  ;;  %v1252_v11 = vpack.c.bf16 %v346_v4, %v342_v3  ;;  %v339_v19 = vld [vmem:[%s2896_s3 + $0x330] sm:$0xff]  ;;  %v344_v20 = vld [vmem:[%s2896_s3 + $0x358] sm:$0xff]  ;;  %v1254_v22 = vpack.c.bf16 %v345_v13, %v341_v12  ;;  %v349_v24 = vld [vmem:[%s2896_s3 + $0x380] sm:$0xff] }
  0x31   :  { %v348_v21 = vld [vmem:[%s2896_s3 + $0x378] sm:$0xff]  ;;  %v353_v25 = vld [vmem:[%s2896_s3 + $0x3a0] sm:$0xff]  ;;  %v343_v28 = vld [vmem:[%s2896_s3 + $0x350] sm:$0xff] }
  0x32   :  { %1231 = vmatpush1.bf16.msra.mxu0 %v1230_v14  ;;  %v1366_v14 = vpack.c.bf16 %v331_v7, %v327_v6  ;;  %v347_v29 = vld [vmem:[%s2896_s3 + $0x370] sm:$0xff]  ;;  %v356_v31 = vld [vmem:[%s2896_s3 + $0x3b8] sm:$0xff]  ;;  %v1258_v32 = vpack.c.bf16 %v353_v25, %v349_v24  ;;  %v357_v43 = vld [vmem:[%s2896_s3 + $0x3c0] sm:$0xff] }
  0x33   :  { %1233 = vmatprep.subr.bf16.mxu0 %v1232_v15  ;;  %1351 = vmatpush1.bf16.msra.mxu1 %v1350_v30  ;;  %v350_v15 = vld [vmem:[%s2896_s3 + $0x388] sm:$0xff]  ;;  %v352_v30 = vld [vmem:[%s2896_s3 + $0x398] sm:$0xff]  ;;  %v351_v35 = vld [vmem:[%s2896_s3 + $0x390] sm:$0xff] }
  0x34   :  { %1353 = vmatprep.subr.bf16.mxu1 %v1352_v33  ;;  %v1256_v23 = vpack.c.bf16 %v354_v16, %v350_v15  ;;  %v1374_v33 = vpack.c.bf16 %v347_v29, %v343_v28  ;;  %v1376_v34 = vpack.c.bf16 %v356_v31, %v352_v30  ;;  %v355_v36 = vld [vmem:[%s2896_s3 + $0x3b0] sm:$0xff]  ;;  %v360_v40 = vld [vmem:[%s2896_s3 + $0x3d8] sm:$0xff]  ;;  %v361_v44 = vld [vmem:[%s2896_s3 + $0x3e0] sm:$0xff] }
  0x35   :  { %v1378_v37 = vpack.c.bf16 %v355_v36, %v351_v35  ;;  %v1262_v46 = vpack.c.bf16 %v361_v44, %v357_v43  ;;  %v359_v47 = vld [vmem:[%s2896_s3 + $0x3d0] sm:$0xff]  ;;  %v368_v52 = vld [vmem:[%s2896_s3 + $0x418] sm:$0xff]  ;;  %v2145_v59 = vld [vmem:[%s2898_s2] sm:$0xf] }
  0x36   :  { %1235 = vmatpush1.bf16.msra.mxu0 %v1234_v26  ;;  %v1370_v26 = vpack.c.bf16 %v339_v19, %v335_v18  ;;  %v363_v48 = vld [vmem:[%s2896_s3 + $0x3f0] sm:$0xff]  ;;  %v365_v0 = vld [vmem:[%s2896_s3 + $0x400] sm:$0xff]  ;;  %v374_v7 = vld [vmem:[%s2896_s3 + $0x448] sm:$0xff] }
  0x37   :  { %1237 = vmatprep.subr.bf16.mxu0 %v1236_v27  ;;  %1355 = vmatpush1.bf16.msra.mxu1 %v1354_v42  ;;  %v1372_v27 = vpack.c.bf16 %v348_v21, %v344_v20  ;;  %v364_v42 = vld [vmem:[%s2896_s3 + $0x3f8] sm:$0xff]  ;;  %v1382_v49 = vpack.c.bf16 %v363_v48, %v359_v47  ;;  %v369_v1 = vld [vmem:[%s2896_s3 + $0x420] sm:$0xff]  ;;  %v371_v6 = vld [vmem:[%s2896_s3 + $0x430] sm:$0xff] }
  0x38   :  { %1357 = vmatprep.subr.bf16.mxu1 %v1356_v45  ;;  %v1380_v45 = vpack.c.bf16 %v364_v42, %v360_v40  ;;  %v378_v9 = vld [vmem:[%s2896_s3 + $0x468] sm:$0xff]  ;;  %v1266_v13 = vpack.c.bf16 %v369_v1, %v365_v0  ;;  %v373_v15 = vld [vmem:[%s2896_s3 + $0x440] sm:$0xff]  ;;  %v375_v21 = vld [vmem:[%s2896_s3 + $0x450] sm:$0xff] }
  0x39   :  { %v377_v16 = vld [vmem:[%s2896_s3 + $0x460] sm:$0xff]  ;;  %v1268_v19 = vpack.c.bf16 %v378_v9, %v374_v7  ;;  %v386_v24 = vld [vmem:[%s2896_s3 + $0x4a8] sm:$0xff]  ;;  %v384_v25 = vld [vmem:[%s2896_s3 + $0x498] sm:$0xff] }
  0x3a   :  { %1239 = vmatpush1.bf16.msra.mxu0 %v1238_v38  ;;  %v358_v38 = vld [vmem:[%s2896_s3 + $0x3c8] sm:$0xff]  ;;  %v1270_v29 = vpack.c.bf16 %v377_v16, %v373_v15  ;;  %v381_v31 = vld [vmem:[%s2896_s3 + $0x480] sm:$0xff]  ;;  %v383_v36 = vld [vmem:[%s2896_s3 + $0x490] sm:$0xff] }
  0x3b   :  { %1241 = vmatprep.subr.bf16.mxu0 %v1240_v39  ;;  %1359 = vmatpush1.bf16.msra.mxu1 %v1358_v54  ;;  %v362_v39 = vld [vmem:[%s2896_s3 + $0x3e8] sm:$0xff]  ;;  %v372_v54 = vld [vmem:[%s2896_s3 + $0x438] sm:$0xff]  ;;  %v399_v1 = vld [vmem:[%s2896_s3 + $0x510] sm:$0xff] }
  0x3c   :  { %1361 = vmatprep.subr.bf16.mxu1 %v1360_v57  ;;  %v1260_v41 = vpack.c.bf16 %v362_v39, %v358_v38  ;;  %v1384_v55 = vpack.c.bf16 %v372_v54, %v368_v52  ;;  %v2137_v57 = vshrl.u32 %v67_v56, 7  ;;  %v390_v38 = vld [vmem:[%s2896_s3 + $0x4c8] sm:$0xff]  ;;  %v392_v40 = vld [vmem:[%s2896_s3 + $0x4d8] sm:$0xff]  ;;  %v411_v15 = vld [vmem:[%s2896_s3 + $0x570] sm:$0xff] }
  0x3d   :  { %v394_v39 = vld [vmem:[%s2896_s3 + $0x4e8] sm:$0xff]  ;;  %v404_v54 = vld [vmem:[%s2896_s3 + $0x538] sm:$0xff] }
  0x3e   :  { %1243 = vmatpush1.bf16.msra.mxu0 %v1242_v50  ;;  %v366_v50 = vld [vmem:[%s2896_s3 + $0x408] sm:$0xff]  ;;  %v2140_v58 = vsub.s32 0, %v2137_v57  ;;  %v2148_v60 = vsub.s32 1, %v2137_v57  ;;  %v1276_v47 = vpack.c.bf16 %v394_v39, %v390_v38  ;;  %v412_v7 = vld [vmem:[%s2896_s3 + $0x578] sm:$0xff]  ;;  %v423_v39 = vld [vmem:[%s2896_s3 + $0x5d0] sm:$0xff] }
  0x3f   :  { %1245 = vmatprep.subr.bf16.mxu0 %v1244_v51  ;;  %1363 = vmatpush1.bf16.msra.mxu1 %v1362_v2  ;;  %v370_v51 = vld [vmem:[%s2896_s3 + $0x428] sm:$0xff]  ;;  %v81_v2 = vsub.s32 3, %v2137_v57 }
  0x40   :  { %1365 = vmatprep.subr.bf16.mxu1 %v1364_v5  ;;  %v1264_v53 = vpack.c.bf16 %v370_v51, %v366_v50  ;;  %v70_v61 = vrot.slane %v2145_v59, %v2140_v58  ;;  %v367_v5 = vld [vmem:[%s2896_s3 + $0x410] sm:$0xff]  ;;  %v398_v51 = vld [vmem:[%s2896_s3 + $0x508] sm:$0xff] }
  0x41   :  { %v395_v50 = vld [vmem:[%s2896_s3 + $0x4f0] sm:$0xff]  ;;  %v402_v52 = vld [vmem:[%s2896_s3 + $0x528] sm:$0xff] }
  0x42   :  { %1247 = vmatpush1.bf16.msra.mxu0 %v1246_v62  ;;  %v74_v62 = vrot.slane %v2145_v59, %v2148_v60  ;;  %v414_v16 = vld [vmem:[%s2896_s3 + $0x588] sm:$0xff] }
  0x43   :  { %1249 = vmatprep.subr.bf16.mxu0 %v1248_v63  ;;  %1367 = vmatpush1.bf16.msra.mxu1 %v1366_v14  ;;  %v1386_v14 = vpack.c.bf16 %v371_v6, %v367_v5  ;;  %v410_v5 = vld [vmem:[%s2896_s3 + $0x568] sm:$0xff]  ;;  %v408_v6 = vld [vmem:[%s2896_s3 + $0x558] sm:$0xff] }
  0x44   :  { %1369 = vmatprep.subr.bf16.mxu1 %v1368_v17  ;;  %v82_v17 = vrot.slane %v2145_v59, %v81_v2 }
  0x46   :  { %1251 = vmatpush1.bf16.msra.mxu0 %v1250_v10  ;;  %v376_v10 = vld [vmem:[%s2896_s3 + $0x458] sm:$0xff] }
  0x47   :  { %1253 = vmatprep.subr.bf16.mxu0 %v1252_v11  ;;  %1371 = vmatpush1.bf16.msra.mxu1 %v1370_v26  ;;  %v380_v11 = vld [vmem:[%s2896_s3 + $0x478] sm:$0xff] }
  0x48   :  { %1373 = vmatprep.subr.bf16.mxu1 %v1372_v27  ;;  %v1388_v20 = vpack.c.bf16 %v380_v11, %v376_v10  ;;  %v388_v26 = vld [vmem:[%s2896_s3 + $0x4b8] sm:$0xff]  ;;  %v405_v10 = vld [vmem:[%s2896_s3 + $0x540] sm:$0xff] }
  0x49   :  { %v1392_v35 = vpack.c.bf16 %v388_v26, %v384_v25  ;;  %v409_v11 = vld [vmem:[%s2896_s3 + $0x560] sm:$0xff]  ;;  %v415_v26 = vld [vmem:[%s2896_s3 + $0x590] sm:$0xff] }
  0x4a   :  { %1255 = vmatpush1.bf16.msra.mxu0 %v1254_v22  ;;  %v379_v22 = vld [vmem:[%s2896_s3 + $0x470] sm:$0xff] }
  0x4b   :  { %1257 = vmatprep.subr.bf16.mxu0 %v1256_v23  ;;  %1375 = vmatpush1.bf16.msra.mxu1 %v1374_v33  ;;  %v382_v23 = vld [vmem:[%s2896_s3 + $0x488] sm:$0xff]  ;;  %v1390_v30 = vpack.c.bf16 %v379_v22, %v375_v21  ;;  %v413_v22 = vld [vmem:[%s2896_s3 + $0x580] sm:$0xff] }
  0x4c   :  { %1377 = vmatprep.subr.bf16.mxu1 %v1376_v34  ;;  %v1272_v34 = vpack.c.bf16 %v386_v24, %v382_v23  ;;  %v417_v23 = vld [vmem:[%s2896_s3 + $0x5a0] sm:$0xff] }
  0x4e   :  { %1259 = vmatpush1.bf16.msra.mxu0 %v1258_v32  ;;  %v385_v32 = vld [vmem:[%s2896_s3 + $0x4a0] sm:$0xff] }
  0x4f   :  { %1379 = vmatpush1.bf16.msra.mxu1 %v1378_v37  ;;  %1261 = vmatprep.subr.bf16.mxu0 %v1260_v41  ;;  %v387_v37 = vld [vmem:[%s2896_s3 + $0x4b0] sm:$0xff]  ;;  %v396_v41 = vld [vmem:[%s2896_s3 + $0x4f8] sm:$0xff]  ;;  %v1274_v43 = vpack.c.bf16 %v385_v32, %v381_v31 }
  0x50   :  { %1381 = vmatprep.subr.bf16.mxu1 %v1380_v45  ;;  %v1394_v44 = vpack.c.bf16 %v387_v37, %v383_v36  ;;  %v389_v45 = vld [vmem:[%s2896_s3 + $0x4c0] sm:$0xff]  ;;  %v1396_v48 = vpack.c.bf16 %v396_v41, %v392_v40  ;;  %v424_v31 = vld [vmem:[%s2896_s3 + $0x5d8] sm:$0xff]  ;;  %v427_v40 = vld [vmem:[%s2896_s3 + $0x5f0] sm:$0xff] }
  0x51   :  { %v428_v32 = vld [vmem:[%s2896_s3 + $0x5f8] sm:$0xff]  ;;  %v425_v36 = vld [vmem:[%s2896_s3 + $0x5e0] sm:$0xff]  ;;  %v430_v41 = vld [vmem:[%s2896_s3 + $0x608] sm:$0xff] }
  0x52   :  { %1263 = vmatpush1.bf16.msra.mxu0 %v1262_v46  ;;  %v393_v46 = vld [vmem:[%s2896_s3 + $0x4e0] sm:$0xff]  ;;  %v1412_v38 = vpack.c.bf16 %v428_v32, %v424_v31  ;;  %v462_v31 = vld [vmem:[%s2896_s3 + $0x708] sm:$0xff] }
  0x53   :  { %1383 = vmatpush1.bf16.msra.mxu1 %v1382_v49  ;;  %1265 = vmatprep.subr.bf16.mxu0 %v1264_v53  ;;  %v391_v49 = vld [vmem:[%s2896_s3 + $0x4d0] sm:$0xff]  ;;  %v400_v53 = vld [vmem:[%s2896_s3 + $0x518] sm:$0xff]  ;;  %v466_v32 = vld [vmem:[%s2896_s3 + $0x728] sm:$0xff] }
  0x54   :  { %1385 = vmatprep.subr.bf16.mxu1 %v1384_v55  ;;  %v1278_v55 = vpack.c.bf16 %v393_v46, %v389_v45  ;;  %v1398_v56 = vpack.c.bf16 %v395_v50, %v391_v49  ;;  %v1400_v0 = vpack.c.bf16 %v404_v54, %v400_v53  ;;  %v1414_v46 = vpack.c.bf16 %v427_v40, %v423_v39  ;;  %v438_v53 = vld [vmem:[%s2896_s3 + $0x648] sm:$0xff] }
  0x55   :  { %v442_v54 = vld [vmem:[%s2896_s3 + $0x668] sm:$0xff]  ;;  %v77_v39 = vsub.s32 2, %v2137_v57  ;;  %v1312_v40 = vpack.c.bf16 %v466_v32, %v462_v31 }
  0x56   :  { %v804_v32 = vld [vmem:[%s2899_s5 + $0x68] sm:$0xff] }
  0xe8   :  { %v157_v63 = vpop.f32.mrb[0].mxu0 }
  0xe9   :  { %v158_v3 = vadd.f32 %v157_v63, %v70_v61  ;;  %v159_v4 = vpop.f32.mrb[1].mxu0  ;;  %v2206_v27 = vpop.f32.mrb[0].mxu1  ;;  %v397_v61 = vld [vmem:[%s2896_s3 + $0x500] sm:$0xff]  ;;  %v1280_v63 = vpack.c.bf16 %v402_v52, %v398_v51  ;;  %v431_v51 = vld [vmem:[%s2896_s3 + $0x610] sm:$0xff] }
  0xea   :  { %v160_v8 = vadd.f32 %v159_v4, %v74_v62  ;;  %v230_v28 = vpop.f32.mrb[1].mxu1  ;;  %v401_v62 = vld [vmem:[%s2896_s3 + $0x520] sm:$0xff]  ;;  %v406_v4 = vld [vmem:[%s2896_s3 + $0x548] sm:$0xff]  ;;  %v435_v52 = vld [vmem:[%s2896_s3 + $0x630] sm:$0xff] }
  0xeb   :  { %v233_v18 = vmax.f32 %v158_v3, 0.0  ;;  %v231_v33 = vadd.f32 %v230_v28, %v82_v17  ;;  %v403_v3 = vld [vmem:[%s2896_s3 + $0x530] sm:$0xff]  ;;  %v418_v17 = vld [vmem:[%s2896_s3 + $0x5a8] sm:$0xff] }
  0xec   :  { %v234_v12 = vmax.f32 %v160_v8, 0.0  ;;  %v1282_v8 = vpack.c.bf16 %v401_v62, %v397_v61  ;;  %v1402_v9 = vpack.c.bf16 %v403_v3, %v399_v1  ;;  %v1288_v24 = vpack.c.bf16 %v418_v17, %v414_v16  ;;  %v419_v28 = vld [vmem:[%s2896_s3 + $0x5b0] sm:$0xff] }
  0xed   :  { %v236_v42 = vmax.f32 %v231_v33, 0.0  ;;  %v1290_v33 = vpack.c.bf16 %v417_v23, %v413_v22  ;;  %v1418_v62 = vpack.c.bf16 %v435_v52, %v431_v51  ;;  %v1300_v1 = vpack.c.bf16 %v442_v54, %v438_v53  ;;  %v447_v16 = vld [vmem:[%s2896_s3 + $0x690] sm:$0xff]  ;;  %v473_v51 = vld [vmem:[%s2896_s3 + $0x760] sm:$0xff] }
  0xee   :  { %567 = vmatprep.mubr.f32.mxu0 %v234_v12  ;;  %709 = vmatprep.mubr.f32.mxu1 %v234_v12  ;;  %v1284_v12 = vpack.c.bf16 %v410_v5, %v406_v4  ;;  %v439_v4 = vld [vmem:[%s2896_s3 + $0x650] sm:$0xff]  ;;  %v78_v52 = vrot.slane %v2145_v59, %v77_v39  ;;  %v794_v59 = vld [vmem:[%s2899_s5 + $0x18] sm:$0xff] }
  0xef   :  { %568 = vmatmul.mubr.f32.vlgmr.msra.gmra.mrb[2].mxu0 %v233_v18  ;;  %710 = vmatmul.mubr.f32.vlgmr.msra.gmra.mrb[2].mxu1 %v233_v18  ;;  %v416_v18 = vld [vmem:[%s2896_s3 + $0x598] sm:$0xff]  ;;  %v443_v5 = vld [vmem:[%s2896_s3 + $0x670] sm:$0xff] }
  0xf0   :  { %1267 = vmatpush1.bf16.msra.mxu0 %v1266_v13  ;;  %1387 = vmatpush1.bf16.msra.mxu1 %v1386_v14  ;;  %v1404_v13 = vpack.c.bf16 %v412_v7, %v408_v6  ;;  %v407_v14 = vld [vmem:[%s2896_s3 + $0x550] sm:$0xff]  ;;  %v446_v6 = vld [vmem:[%s2896_s3 + $0x688] sm:$0xff] }
  0xf1   :  { %1269 = vmatprep.subr.bf16.mxu0 %v1268_v19  ;;  %1389 = vmatprep.subr.bf16.mxu1 %v1388_v20  ;;  %v420_v19 = vld [vmem:[%s2896_s3 + $0x5b8] sm:$0xff]  ;;  %v1286_v20 = vpack.c.bf16 %v409_v11, %v405_v10  ;;  %v1406_v21 = vpack.c.bf16 %v411_v15, %v407_v14  ;;  %v450_v7 = vld [vmem:[%s2896_s3 + $0x6a8] sm:$0xff]  ;;  %v1422_v11 = vpack.c.bf16 %v443_v5, %v439_v4  ;;  %v451_v17 = vld [vmem:[%s2896_s3 + $0x6b0] sm:$0xff] }
  0xf2   :  { %1163 = vmatprep.mubr.msk.f32.mxu0 %vm499_vm1, %v236_v42  ;;  %1164 = vmatprep.mubr.msk.f32.mxu1 %vm499_vm1, %v236_v42  ;;  %v1408_v25 = vpack.c.bf16 %v420_v19, %v416_v18  ;;  %v434_v42 = vld [vmem:[%s2896_s3 + $0x628] sm:$0xff]  ;;  %v1304_v14 = vpack.c.bf16 %v450_v7, %v446_v6  ;;  %v1426_v23 = vpack.c.bf16 %v451_v17, %v447_v16  ;;  %v793_v4 = vld [vmem:[%s2899_s5 + $0x10] sm:$0xff] }
  0xf3   :  { %v1296_v49 = vpack.c.bf16 %v434_v42, %v430_v41  ;;  %v454_v18 = vld [vmem:[%s2896_s3 + $0x6c8] sm:$0xff]  ;;  %v463_v42 = vld [vmem:[%s2896_s3 + $0x710] sm:$0xff]  ;;  %v229_v5 = vadd.f32 %v2206_v27, %v78_v52  ;;  %v798_v27 = vld [vmem:[%s2899_s5 + $0x38] sm:$0xff] }
  0xf4   :  { %1271 = vmatpush1.bf16.msra.mxu0 %v1270_v29  ;;  %1391 = vmatpush1.bf16.msra.mxu1 %v1390_v30  ;;  %v422_v29 = vld [vmem:[%s2896_s3 + $0x5c8] sm:$0xff] }
  0xf5   :  { %1273 = vmatprep.subr.bf16.mxu0 %v1272_v34  ;;  %1393 = vmatprep.subr.bf16.mxu1 %v1392_v35  ;;  %v426_v30 = vld [vmem:[%s2896_s3 + $0x5e8] sm:$0xff]  ;;  %v1410_v34 = vpack.c.bf16 %v419_v28, %v415_v26  ;;  %v421_v35 = vld [vmem:[%s2896_s3 + $0x5c0] sm:$0xff]  ;;  %v235_v17 = vmax.f32 %v229_v5, 0.0 }
  0xf6   :  { %v1292_v37 = vpack.c.bf16 %v426_v30, %v422_v29  ;;  %v1294_v45 = vpack.c.bf16 %v425_v36, %v421_v35  ;;  %v458_v19 = vld [vmem:[%s2896_s3 + $0x6e8] sm:$0xff]  ;;  %v455_v29 = vld [vmem:[%s2896_s3 + $0x6d0] sm:$0xff]  ;;  %v811_v5 = vld [vmem:[%s2899_s5 + $0xa0] sm:$0xff] }
  0xf7   :  { %v1308_v26 = vpack.c.bf16 %v458_v19, %v454_v18  ;;  %v459_v30 = vld [vmem:[%s2896_s3 + $0x6f0] sm:$0xff]  ;;  %v796_v7 = vld [vmem:[%s2899_s5 + $0x28] sm:$0xff] }
  0xf8   :  { %1275 = vmatpush1.bf16.msra.mxu0 %v1274_v43  ;;  %1395 = vmatpush1.bf16.msra.mxu1 %v1394_v44  ;;  %v432_v43 = vld [vmem:[%s2896_s3 + $0x618] sm:$0xff]  ;;  %v1430_v36 = vpack.c.bf16 %v459_v30, %v455_v29  ;;  %v1444_v18 = vpack.c.bf16 %v798_v27, %v796_v7  ;;  %v800_v19 = vld [vmem:[%s2899_s5 + $0x48] sm:$0xff]  ;;  %v801_v29 = vld [vmem:[%s2899_s5 + $0x50] sm:$0xff] }
  0xf9   :  { %1277 = vmatprep.subr.bf16.mxu0 %v1276_v47  ;;  %1397 = vmatprep.subr.bf16.mxu1 %v1396_v48  ;;  %v436_v44 = vld [vmem:[%s2896_s3 + $0x638] sm:$0xff]  ;;  %v429_v47 = vld [vmem:[%s2896_s3 + $0x600] sm:$0xff] }
  0xfa   :  { %v433_v48 = vld [vmem:[%s2896_s3 + $0x620] sm:$0xff]  ;;  %v1416_v50 = vpack.c.bf16 %v436_v44, %v432_v43  ;;  %v467_v43 = vld [vmem:[%s2896_s3 + $0x730] sm:$0xff]  ;;  %v470_v44 = vld [vmem:[%s2896_s3 + $0x748] sm:$0xff] }
  0xfb   :  { %v1298_v61 = vpack.c.bf16 %v433_v48, %v429_v47  ;;  %v476_v47 = vld [vmem:[%s2896_s3 + $0x778] sm:$0xff]  ;;  %v875_v27 = vld [vmem:[%s2899_s5 + $0x2a0] sm:$0xff] }
  0xfc   :  { %1279 = vmatpush1.bf16.msra.mxu0 %v1278_v55  ;;  %1399 = vmatpush1.bf16.msra.mxu1 %v1398_v56  ;;  %v440_v55 = vld [vmem:[%s2896_s3 + $0x658] sm:$0xff] }
  0xfd   :  { %1281 = vmatprep.subr.bf16.mxu0 %v1280_v63  ;;  %1401 = vmatprep.subr.bf16.mxu1 %v1400_v0  ;;  %v444_v56 = vld [vmem:[%s2896_s3 + $0x678] sm:$0xff]  ;;  %v437_v63 = vld [vmem:[%s2896_s3 + $0x640] sm:$0xff] }
  0xfe   :  { %v441_v0 = vld [vmem:[%s2896_s3 + $0x660] sm:$0xff]  ;;  %v1420_v3 = vpack.c.bf16 %v444_v56, %v440_v55  ;;  %v471_v55 = vld [vmem:[%s2896_s3 + $0x750] sm:$0xff] }
  0xff   :  { %v1302_v10 = vpack.c.bf16 %v441_v0, %v437_v63  ;;  %v475_v56 = vld [vmem:[%s2896_s3 + $0x770] sm:$0xff]  ;;  %v858_v63 = vld [vmem:[%s2899_s5 + $0x218] sm:$0xff] }
 0x100   :  { %1283 = vmatpush1.bf16.msra.mxu0 %v1282_v8  ;;  %1403 = vmatpush1.bf16.msra.mxu1 %v1402_v9  ;;  %v448_v8 = vld [vmem:[%s2896_s3 + $0x698] sm:$0xff] }
 0x101   :  { %1285 = vmatprep.subr.bf16.mxu0 %v1284_v12  ;;  %1405 = vmatprep.subr.bf16.mxu1 %v1404_v13  ;;  %v452_v9 = vld [vmem:[%s2896_s3 + $0x6b8] sm:$0xff]  ;;  %v445_v12 = vld [vmem:[%s2896_s3 + $0x680] sm:$0xff] }
 0x102   :  { %v449_v13 = vld [vmem:[%s2896_s3 + $0x6a0] sm:$0xff]  ;;  %v1424_v15 = vpack.c.bf16 %v452_v9, %v448_v8 }
 0x103   :  { %v1306_v22 = vpack.c.bf16 %v449_v13, %v445_v12  ;;  %v855_v9 = vld [vmem:[%s2899_s5 + $0x200] sm:$0xff]  ;;  %v862_v12 = vld [vmem:[%s2899_s5 + $0x238] sm:$0xff] }
 0x104   :  { %1287 = vmatpush1.bf16.msra.mxu0 %v1286_v20  ;;  %1407 = vmatpush1.bf16.msra.mxu1 %v1406_v21  ;;  %v456_v20 = vld [vmem:[%s2896_s3 + $0x6d8] sm:$0xff] }
 0x105   :  { %1289 = vmatprep.subr.bf16.mxu0 %v1288_v24  ;;  %1409 = vmatprep.subr.bf16.mxu1 %v1408_v25  ;;  %v460_v21 = vld [vmem:[%s2896_s3 + $0x6f8] sm:$0xff]  ;;  %v453_v24 = vld [vmem:[%s2896_s3 + $0x6c0] sm:$0xff] }
 0x106   :  { %v457_v25 = vld [vmem:[%s2896_s3 + $0x6e0] sm:$0xff]  ;;  %v1428_v28 = vpack.c.bf16 %v460_v21, %v456_v20 }
 0x107   :  { %v1310_v35 = vpack.c.bf16 %v457_v25, %v453_v24  ;;  %v859_v21 = vld [vmem:[%s2899_s5 + $0x220] sm:$0xff]  ;;  %v864_v24 = vld [vmem:[%s2899_s5 + $0x248] sm:$0xff]  ;;  %v866_v25 = vld [vmem:[%s2899_s5 + $0x258] sm:$0xff] }
 0x108   :  { %1291 = vmatpush1.bf16.msra.mxu0 %v1290_v33  ;;  %1411 = vmatpush1.bf16.msra.mxu1 %v1410_v34  ;;  %v464_v33 = vld [vmem:[%s2896_s3 + $0x718] sm:$0xff] }
 0x109   :  { %1293 = vmatprep.subr.bf16.mxu0 %v1292_v37  ;;  %1413 = vmatprep.subr.bf16.mxu1 %v1412_v38  ;;  %v468_v34 = vld [vmem:[%s2896_s3 + $0x738] sm:$0xff]  ;;  %v461_v37 = vld [vmem:[%s2896_s3 + $0x700] sm:$0xff] }
 0x10a   :  { %v465_v38 = vld [vmem:[%s2896_s3 + $0x720] sm:$0xff]  ;;  %v1432_v41 = vpack.c.bf16 %v468_v34, %v464_v33  ;;  %v1512_v33 = vpack.c.bf16 %v866_v25, %v864_v24  ;;  %v822_v24 = vld [vmem:[%s2899_s5 + $0xf8] sm:$0xff]  ;;  %v884_v25 = vld [vmem:[%s2899_s5 + $0x2e8] sm:$0xff] }
 0x10b   :  { %v1314_v48 = vpack.c.bf16 %v465_v38, %v461_v37  ;;  %v863_v34 = vld [vmem:[%s2899_s5 + $0x240] sm:$0xff]  ;;  %v868_v37 = vld [vmem:[%s2899_s5 + $0x268] sm:$0xff]  ;;  %v870_v38 = vld [vmem:[%s2899_s5 + $0x278] sm:$0xff] }
 0x10c   :  { %1295 = vmatpush1.bf16.msra.mxu0 %v1294_v45  ;;  %1415 = vmatpush1.bf16.msra.mxu1 %v1414_v46  ;;  %v474_v45 = vld [vmem:[%s2896_s3 + $0x768] sm:$0xff]  ;;  %v472_v46 = vld [vmem:[%s2896_s3 + $0x758] sm:$0xff] }
 0x10d   :  { %1297 = vmatprep.subr.bf16.mxu0 %v1296_v49  ;;  %1417 = vmatprep.subr.bf16.mxu1 %v1416_v50  ;;  %v1434_v49 = vpack.c.bf16 %v467_v43, %v463_v42  ;;  %v469_v50 = vld [vmem:[%s2896_s3 + $0x740] sm:$0xff]  ;;  %v1316_v53 = vpack.c.bf16 %v474_v45, %v470_v44  ;;  %v1436_v54 = vpack.c.bf16 %v476_v47, %v472_v46  ;;  %v805_v42 = vld [vmem:[%s2899_s5 + $0x70] sm:$0xff]  ;;  %v808_v45 = vld [vmem:[%s2899_s5 + $0x88] sm:$0xff] }
 0x10e   :  { %v1318_v0 = vpack.c.bf16 %v473_v51, %v469_v50  ;;  %v1516_v46 = vpack.c.bf16 %v870_v38, %v868_v37  ;;  %v867_v47 = vld [vmem:[%s2899_s5 + $0x260] sm:$0xff]  ;;  %v872_v50 = vld [vmem:[%s2899_s5 + $0x288] sm:$0xff]  ;;  %v874_v51 = vld [vmem:[%s2899_s5 + $0x298] sm:$0xff] }
 0x10f   :  { %v826_v37 = vld [vmem:[%s2899_s5 + $0x118] sm:$0xff]  ;;  %v888_v38 = vld [vmem:[%s2899_s5 + $0x308] sm:$0xff] }
 0x110   :  { %1299 = vmatpush1.bf16.msra.mxu0 %v1298_v61  ;;  %1419 = vmatpush1.bf16.msra.mxu1 %v1418_v62  ;;  %v792_v61 = vld [vmem:[%s2899_s5 + $0x8] sm:$0xff] }
 0x111   :  { %1301 = vmatprep.subr.bf16.mxu0 %v1300_v1  ;;  %1421 = vmatprep.subr.bf16.mxu1 %v1420_v3  ;;  %v856_v62 = vld [vmem:[%s2899_s5 + $0x208] sm:$0xff]  ;;  %v1438_v1 = vpack.c.bf16 %v475_v56, %v471_v55  ;;  %v791_v3 = vld [vmem:[%s2899_s5] sm:$0xff]  ;;  %v1440_v6 = vpack.c.bf16 %v794_v59, %v792_v61  ;;  %v1520_v59 = vpack.c.bf16 %v874_v51, %v872_v50 }
 0x112   :  { %v1504_v8 = vpack.c.bf16 %v858_v63, %v856_v62  ;;  %v1442_v13 = vpack.c.bf16 %v793_v4, %v791_v3  ;;  %v812_v61 = vld [vmem:[%s2899_s5 + $0xa8] sm:$0xff]  ;;  %v871_v62 = vld [vmem:[%s2899_s5 + $0x280] sm:$0xff]  ;;  %v873_v63 = vld [vmem:[%s2899_s5 + $0x290] sm:$0xff] }
 0x113   :  { %v878_v3 = vld [vmem:[%s2899_s5 + $0x2b8] sm:$0xff]  ;;  %v1522_v7 = vpack.c.bf16 %v873_v63, %v871_v62  ;;  %v827_v51 = vld [vmem:[%s2899_s5 + $0x120] sm:$0xff]  ;;  %v836_v62 = vld [vmem:[%s2899_s5 + $0x168] sm:$0xff] }
 0x114   :  { %1303 = vmatpush1.bf16.msra.mxu0 %v1302_v10  ;;  %1423 = vmatpush1.bf16.msra.mxu1 %v1422_v11  ;;  %v857_v10 = vld [vmem:[%s2899_s5 + $0x210] sm:$0xff]  ;;  %v860_v11 = vld [vmem:[%s2899_s5 + $0x228] sm:$0xff]  ;;  %v838_v63 = vld [vmem:[%s2899_s5 + $0x178] sm:$0xff] }
 0x115   :  { %1305 = vmatprep.subr.bf16.mxu0 %v1304_v14  ;;  %1425 = vmatprep.subr.bf16.mxu1 %v1424_v15  ;;  %v795_v14 = vld [vmem:[%s2899_s5 + $0x20] sm:$0xff]  ;;  %v797_v15 = vld [vmem:[%s2899_s5 + $0x30] sm:$0xff]  ;;  %v1506_v16 = vpack.c.bf16 %v857_v10, %v855_v9  ;;  %v1508_v20 = vpack.c.bf16 %v862_v12, %v860_v11  ;;  %v816_v9 = vld [vmem:[%s2899_s5 + $0xc8] sm:$0xff] }
 0x116   :  { %v877_v11 = vld [vmem:[%s2899_s5 + $0x2b0] sm:$0xff]  ;;  %v818_v12 = vld [vmem:[%s2899_s5 + $0xd8] sm:$0xff] }
 0x118   :  { %1307 = vmatpush1.bf16.msra.mxu0 %v1306_v22  ;;  %1427 = vmatpush1.bf16.msra.mxu1 %v1426_v23  ;;  %v861_v22 = vld [vmem:[%s2899_s5 + $0x230] sm:$0xff]  ;;  %v802_v23 = vld [vmem:[%s2899_s5 + $0x58] sm:$0xff] }
 0x119   :  { %1309 = vmatprep.subr.bf16.mxu0 %v1308_v26  ;;  %1429 = vmatprep.subr.bf16.mxu1 %v1428_v28  ;;  %v1446_v26 = vpack.c.bf16 %v797_v15, %v795_v14  ;;  %v799_v28 = vld [vmem:[%s2899_s5 + $0x40] sm:$0xff]  ;;  %v1510_v30 = vpack.c.bf16 %v861_v22, %v859_v21  ;;  %v1448_v31 = vpack.c.bf16 %v802_v23, %v800_v19  ;;  %v882_v14 = vld [vmem:[%s2899_s5 + $0x2d8] sm:$0xff]  ;;  %v881_v23 = vld [vmem:[%s2899_s5 + $0x2d0] sm:$0xff] }
 0x11a   :  { %v1464_v19 = vpack.c.bf16 %v818_v12, %v816_v9  ;;  %v879_v22 = vld [vmem:[%s2899_s5 + $0x2c0] sm:$0xff] }
 0x11b   :  { %v839_v9 = vld [vmem:[%s2899_s5 + $0x180] sm:$0xff] }
 0x11c   :  { %1311 = vmatpush1.bf16.msra.mxu0 %v1310_v35  ;;  %1431 = vmatpush1.bf16.msra.mxu1 %v1430_v36  ;;  %v865_v35 = vld [vmem:[%s2899_s5 + $0x250] sm:$0xff]  ;;  %v806_v36 = vld [vmem:[%s2899_s5 + $0x78] sm:$0xff] }
 0x11d   :  { %1313 = vmatprep.subr.bf16.mxu0 %v1312_v40  ;;  %1433 = vmatprep.subr.bf16.mxu1 %v1432_v41  ;;  %v1450_v40 = vpack.c.bf16 %v801_v29, %v799_v28  ;;  %v803_v41 = vld [vmem:[%s2899_s5 + $0x60] sm:$0xff]  ;;  %v1514_v43 = vpack.c.bf16 %v865_v35, %v863_v34  ;;  %v1452_v44 = vpack.c.bf16 %v806_v36, %v804_v32  ;;  %v885_v36 = vld [vmem:[%s2899_s5 + $0x2f0] sm:$0xff] }
 0x11e   :  { %v1454_v52 = vpack.c.bf16 %v805_v42, %v803_v41  ;;  %v819_v29 = vld [vmem:[%s2899_s5 + $0xe0] sm:$0xff] }
 0x11f   :  { %v883_v35 = vld [vmem:[%s2899_s5 + $0x2e0] sm:$0xff] }
 0x120   :  { %1315 = vmatpush1.bf16.msra.mxu0 %v1314_v48  ;;  %1435 = vmatpush1.bf16.msra.mxu1 %v1434_v49  ;;  %v869_v48 = vld [vmem:[%s2899_s5 + $0x270] sm:$0xff]  ;;  %v810_v49 = vld [vmem:[%s2899_s5 + $0x98] sm:$0xff]  ;;  %v1534_v42 = vpack.c.bf16 %v885_v36, %v883_v35  ;;  %v891_v36 = vld [vmem:[%s2899_s5 + $0x320] sm:$0xff] }
 0x121   :  { %1317 = vmatprep.subr.bf16.mxu0 %v1316_v53  ;;  %1437 = vmatprep.subr.bf16.mxu1 %v1436_v54  ;;  %v807_v53 = vld [vmem:[%s2899_s5 + $0x80] sm:$0xff]  ;;  %v809_v54 = vld [vmem:[%s2899_s5 + $0x90] sm:$0xff]  ;;  %v1518_v55 = vpack.c.bf16 %v869_v48, %v867_v47  ;;  %v1456_v56 = vpack.c.bf16 %v810_v49, %v808_v45  ;;  %v828_v47 = vld [vmem:[%s2899_s5 + $0x128] sm:$0xff] }
 0x122   :  { %v1458_v4 = vpack.c.bf16 %v809_v54, %v807_v53  ;;  %v825_v45 = vld [vmem:[%s2899_s5 + $0x110] sm:$0xff]  ;;  %v830_v48 = vld [vmem:[%s2899_s5 + $0x138] sm:$0xff]  ;;  %v832_v53 = vld [vmem:[%s2899_s5 + $0x148] sm:$0xff] }
 0x123   :  { %v1476_v50 = vpack.c.bf16 %v830_v48, %v828_v47  ;;  %v834_v54 = vld [vmem:[%s2899_s5 + $0x158] sm:$0xff] }
 0x124   :  { %1319 = vmatpush1.bf16.msra.mxu0 %v1318_v0  ;;  %1439 = vmatpush1.bf16.msra.mxu1 %v1438_v1  ;;  %v814_v0 = vld [vmem:[%s2899_s5 + $0xb8] sm:$0xff]  ;;  %v876_v1 = vld [vmem:[%s2899_s5 + $0x2a8] sm:$0xff] }
 0x125   :  { %1441 = vmatprep.subr.bf16.mxu0 %v1440_v6  ;;  %1505 = vmatprep.subr.bf16.mxu1 %v1504_v8  ;;  %v813_v6 = vld [vmem:[%s2899_s5 + $0xb0] sm:$0xff]  ;;  %v1460_v8 = vpack.c.bf16 %v814_v0, %v812_v61  ;;  %v1524_v10 = vpack.c.bf16 %v878_v3, %v876_v1  ;;  %v831_v61 = vld [vmem:[%s2899_s5 + $0x140] sm:$0xff]  ;;  %v1484_v1 = vpack.c.bf16 %v838_v63, %v836_v62  ;;  %v1058_v62 = vld [vmem:[%s2901_s7 + $0x18] sm:$0xff] }
 0x126   :  { %v1462_v15 = vpack.c.bf16 %v813_v6, %v811_v5  ;;  %v835_v3 = vld [vmem:[%s2899_s5 + $0x160] sm:$0xff]  ;;  %v840_v5 = vld [vmem:[%s2899_s5 + $0x188] sm:$0xff]  ;;  %v842_v6 = vld [vmem:[%s2899_s5 + $0x198] sm:$0xff] }
 0x127   :  { %639 = vmatmul.mubr.f32.vlgmr.msra.gmra.mrb[2].mxu0 %v235_v17  ;;  %781 = vmatmul.mubr.f32.vlgmr.msra.gmra.mrb[2].mxu1 %v235_v17  ;;  %v817_v17 = vld [vmem:[%s2899_s5 + $0xd0] sm:$0xff] }
 0x128   :  { %1443 = vmatpush1.bf16.msra.mxu0 %v1442_v13  ;;  %1507 = vmatpush1.bf16.msra.mxu1 %v1506_v16  ;;  %v880_v13 = vld [vmem:[%s2899_s5 + $0x2c8] sm:$0xff]  ;;  %v815_v16 = vld [vmem:[%s2899_s5 + $0xc0] sm:$0xff] }
 0x129   :  { %1445 = vmatprep.subr.bf16.mxu0 %v1444_v18  ;;  %1509 = vmatprep.subr.bf16.mxu1 %v1508_v20  ;;  %v1526_v18 = vpack.c.bf16 %v877_v11, %v875_v27  ;;  %v820_v20 = vld [vmem:[%s2899_s5 + $0xe8] sm:$0xff]  ;;  %v1528_v21 = vpack.c.bf16 %v882_v14, %v880_v13  ;;  %v1466_v28 = vpack.c.bf16 %v817_v17, %v815_v16  ;;  %v846_v11 = vld [vmem:[%s2899_s5 + $0x1b8] sm:$0xff]  ;;  %v843_v14 = vld [vmem:[%s2899_s5 + $0x1a0] sm:$0xff] }
 0x12a   :  { %v1468_v32 = vpack.c.bf16 %v822_v24, %v820_v20  ;;  %v844_v27 = vld [vmem:[%s2899_s5 + $0x1a8] sm:$0xff]  ;;  %v850_v17 = vld [vmem:[%s2899_s5 + $0x1d8] sm:$0xff]  ;;  %v847_v20 = vld [vmem:[%s2899_s5 + $0x1c0] sm:$0xff] }
 0x12b   :  { %v1492_v13 = vpack.c.bf16 %v846_v11, %v844_v27  ;;  %v848_v16 = vld [vmem:[%s2899_s5 + $0x1c8] sm:$0xff]  ;;  %v889_v24 = vld [vmem:[%s2899_s5 + $0x310] sm:$0xff]  ;;  %v1066_v27 = vld [vmem:[%s2901_s7 + $0x58] sm:$0xff] }
 0x12c   :  { %1447 = vmatpush1.bf16.msra.mxu0 %v1446_v26  ;;  %1511 = vmatpush1.bf16.msra.mxu1 %v1510_v30  ;;  %v886_v26 = vld [vmem:[%s2899_s5 + $0x2f8] sm:$0xff]  ;;  %v821_v30 = vld [vmem:[%s2899_s5 + $0xf0] sm:$0xff] }
 0x12d   :  { %1449 = vmatprep.subr.bf16.mxu0 %v1448_v31  ;;  %1513 = vmatprep.subr.bf16.mxu1 %v1512_v33  ;;  %v1530_v31 = vpack.c.bf16 %v881_v23, %v879_v22  ;;  %v824_v33 = vld [vmem:[%s2899_s5 + $0x108] sm:$0xff]  ;;  %v1532_v34 = vpack.c.bf16 %v886_v26, %v884_v25  ;;  %v1470_v41 = vpack.c.bf16 %v821_v30, %v819_v29  ;;  %v887_v22 = vld [vmem:[%s2899_s5 + $0x300] sm:$0xff] }
 0x12e   :  { %v1538_v25 = vpack.c.bf16 %v889_v24, %v887_v22  ;;  %v852_v26 = vld [vmem:[%s2899_s5 + $0x1e8] sm:$0xff]  ;;  %v1074_v22 = vld [vmem:[%s2901_s7 + $0x98] sm:$0xff]  ;;  %v895_v24 = vld [vmem:[%s2902_s6] sm:$0x3] }
 0x12f   :  { %v892_v29 = vld [vmem:[%s2899_s5 + $0x328] sm:$0xff] }
 0x130   :  { %1451 = vmatpush1.bf16.msra.mxu0 %v1450_v40  ;;  %1515 = vmatpush1.bf16.msra.mxu1 %v1514_v43  ;;  %v890_v40 = vld [vmem:[%s2899_s5 + $0x318] sm:$0xff]  ;;  %v1472_v43 = vpack.c.bf16 %v826_v37, %v824_v33  ;;  %v853_v33 = vld [vmem:[%s2899_s5 + $0x1f0] sm:$0xff] }
 0x131   :  { %1453 = vmatprep.subr.bf16.mxu0 %v1452_v44  ;;  %1517 = vmatprep.subr.bf16.mxu1 %v1516_v46  ;;  %v823_v44 = vld [vmem:[%s2899_s5 + $0x100] sm:$0xff]  ;;  %v1536_v46 = vpack.c.bf16 %v890_v40, %v888_v38  ;;  %v893_v37 = vld [vmem:[%s2899_s5 + $0x330] sm:$0xff]  ;;  %v1589_v40 = vmov 0.0|0.0  }
 0x132   :  { %v1474_v49 = vpack.c.bf16 %v825_v45, %v823_v44  ;;  %v1542_v38 = vpack.c.bf16 %v893_v37, %v891_v36 }
 0x134   :  { %1455 = vmatpush1.bf16.msra.mxu0 %v1454_v52  ;;  %1519 = vmatpush1.bf16.msra.mxu1 %v1518_v55  ;;  %v829_v52 = vld [vmem:[%s2899_s5 + $0x130] sm:$0xff] }
 0x135   :  { %1457 = vmatprep.subr.bf16.mxu0 %v1456_v56  ;;  %1521 = vmatprep.subr.bf16.mxu1 %v1520_v59  ;;  %v1478_v55 = vpack.c.bf16 %v829_v52, %v827_v51  ;;  %v1480_v56 = vpack.c.bf16 %v834_v54, %v832_v53  ;;  %v833_v59 = vld [vmem:[%s2899_s5 + $0x150] sm:$0xff]  ;;  %v1055_v52 = vld [vmem:[%s2901_s7] sm:$0xff]  ;;  %v1056_v53 = vld [vmem:[%s2901_s7 + $0x8] sm:$0xff] }
 0x136   :  { %v1482_v0 = vpack.c.bf16 %v833_v59, %v831_v61  ;;  %v1057_v59 = vld [vmem:[%s2901_s7 + $0x10] sm:$0xff] }
 0x137   :  { %v1548_v63 = vpack.c.bf16 %v1058_v62, %v1057_v59 }
 0x138   :  { %1459 = vmatpush1.bf16.msra.mxu0 %v1458_v4  ;;  %1523 = vmatpush1.bf16.msra.mxu1 %v1522_v7  ;;  %v837_v4 = vld [vmem:[%s2899_s5 + $0x170] sm:$0xff] }
 0x139   :  { %1461 = vmatprep.subr.bf16.mxu0 %v1460_v8  ;;  %1525 = vmatprep.subr.bf16.mxu1 %v1524_v10  ;;  %v1486_v7 = vpack.c.bf16 %v837_v4, %v835_v3  ;;  %v1488_v8 = vpack.c.bf16 %v842_v6, %v840_v5  ;;  %v841_v10 = vld [vmem:[%s2899_s5 + $0x190] sm:$0xff]  ;;  %v1062_v5 = vld [vmem:[%s2901_s7 + $0x38] sm:$0xff] }
 0x13a   :  { %v1490_v12 = vpack.c.bf16 %v841_v10, %v839_v9  ;;  %v1061_v4 = vld [vmem:[%s2901_s7 + $0x30] sm:$0xff] }
 0x13b   :  { %v1554_v6 = vpack.c.bf16 %v1062_v5, %v1061_v4  ;;  %v1065_v10 = vld [vmem:[%s2901_s7 + $0x50] sm:$0xff] }
 0x13c   :  { %1463 = vmatpush1.bf16.msra.mxu0 %v1462_v15  ;;  %1527 = vmatpush1.bf16.msra.mxu1 %v1526_v18  ;;  %v845_v15 = vld [vmem:[%s2899_s5 + $0x1b0] sm:$0xff]  ;;  %v1560_v11 = vpack.c.bf16 %v1066_v27, %v1065_v10 }
 0x13d   :  { %1465 = vmatprep.subr.bf16.mxu0 %v1464_v19  ;;  %1529 = vmatprep.subr.bf16.mxu1 %v1528_v21  ;;  %v1494_v18 = vpack.c.bf16 %v845_v15, %v843_v14  ;;  %v1496_v19 = vpack.c.bf16 %v850_v17, %v848_v16  ;;  %v849_v21 = vld [vmem:[%s2899_s5 + $0x1d0] sm:$0xff]  ;;  %v1070_v16 = vld [vmem:[%s2901_s7 + $0x78] sm:$0xff] }
 0x13e   :  { %v1498_v23 = vpack.c.bf16 %v849_v21, %v847_v20  ;;  %v1069_v15 = vld [vmem:[%s2901_s7 + $0x70] sm:$0xff] }
 0x13f   :  { %v1566_v17 = vpack.c.bf16 %v1070_v16, %v1069_v15  ;;  %v1073_v21 = vld [vmem:[%s2901_s7 + $0x90] sm:$0xff] }
 0x140   :  { %1467 = vmatpush1.bf16.msra.mxu0 %v1466_v28  ;;  %1531 = vmatpush1.bf16.msra.mxu1 %v1530_v31  ;;  %v854_v28 = vld [vmem:[%s2899_s5 + $0x1f8] sm:$0xff] }
 0x141   :  { %1469 = vmatprep.subr.bf16.mxu0 %v1468_v32  ;;  %1533 = vmatprep.subr.bf16.mxu1 %v1532_v34  ;;  %v1500_v30 = vpack.c.bf16 %v854_v28, %v852_v26  ;;  %v894_v31 = vld [vmem:[%s2899_s5 + $0x338] sm:$0xff]  ;;  %v851_v32 = vld [vmem:[%s2899_s5 + $0x1e0] sm:$0xff]  ;;  %v904_v26 = vrot.slane %v895_v24, %v2148_v60 }
 0x142   :  { %v1540_v34 = vpack.c.bf16 %v894_v31, %v892_v29  ;;  %v1502_v35 = vpack.c.bf16 %v853_v33, %v851_v32 }
 0x144   :  { %1471 = vmatpush1.bf16.msra.mxu0 %v1470_v41  ;;  %1535 = vmatpush1.bf16.msra.mxu1 %v1534_v42  ;;  %v477_v41 = vld [vmem:[%s2900_s4] sm:$0xf] }
 0x145   :  { %1473 = vmatprep.subr.bf16.mxu0 %v1472_v43  ;;  %1537 = vmatprep.subr.bf16.mxu1 %v1536_v46  ;;  %v482_v42 = vrot.slane %v477_v41, %v2140_v58  ;;  %v490_v43 = vrot.slane %v477_v41, %v77_v39  ;;  %v486_v44 = vrot.slane %v477_v41, %v2148_v60 }
 0x146   :  { %v494_v45 = vrot.slane %v477_v41, %v81_v2  ;;  %v1545_v2 = vpack.c.bf16 %v1056_v53, %v1055_v52 }
 0x148   :  { %1475 = vmatpush1.bf16.msra.mxu0 %v1474_v49  ;;  %1539 = vmatpush1.bf16.msra.mxu1 %v1538_v25  ;;  %v900_v25 = vrot.slane %v895_v24, %v2140_v58 }
 0x149   :  { %1477 = vmatprep.subr.bf16.mxu0 %v1476_v50  ;;  %1541 = vmatprep.subr.bf16.mxu1 %v1540_v34 }
 0x14c   :  { %1479 = vmatpush1.bf16.msra.mxu0 %v1478_v55  ;;  %1543 = vmatpush1.bf16.msra.mxu1 %v1542_v38  ;;  %v1166_v38 = vld [vmem:[%s2903_s8] ss:$0 sm:$0xff] }
 0x14d   :  { %1481 = vmatprep.subr.bf16.mxu0 %v1480_v56  ;;  %1544 = vmatprep.subr.bf16.mxu1 %v1589_v40 }
 0x150   :  { %1483 = vmatpush1.bf16.msra.mxu0 %v1482_v0  ;;  %v1059_v0 = vld [vmem:[%s2901_s7 + $0x20] sm:$0xff] }
 0x151   :  { %1485 = vmatprep.subr.bf16.mxu0 %v1484_v1  ;;  %v1060_v1 = vld [vmem:[%s2901_s7 + $0x28] sm:$0xff] }
 0x152   :  { %v1551_v3 = vpack.c.bf16 %v1060_v1, %v1059_v0 }
 0x154   :  { %1487 = vmatpush1.bf16.msra.mxu0 %v1486_v7  ;;  %v1063_v7 = vld [vmem:[%s2901_s7 + $0x40] sm:$0xff] }
 0x155   :  { %1489 = vmatprep.subr.bf16.mxu0 %v1488_v8  ;;  %v1064_v8 = vld [vmem:[%s2901_s7 + $0x48] sm:$0xff] }
 0x156   :  { %v1557_v9 = vpack.c.bf16 %v1064_v8, %v1063_v7 }
 0x158   :  { %1491 = vmatpush1.bf16.msra.mxu0 %v1490_v12  ;;  %v1067_v12 = vld [vmem:[%s2901_s7 + $0x60] sm:$0xff] }
 0x159   :  { %1493 = vmatprep.subr.bf16.mxu0 %v1492_v13  ;;  %v1068_v13 = vld [vmem:[%s2901_s7 + $0x68] sm:$0xff] }
 0x15a   :  { %v1563_v14 = vpack.c.bf16 %v1068_v13, %v1067_v12 }
 0x15c   :  { %1495 = vmatpush1.bf16.msra.mxu0 %v1494_v18  ;;  %v1071_v18 = vld [vmem:[%s2901_s7 + $0x80] sm:$0xff] }
 0x15d   :  { %1497 = vmatprep.subr.bf16.mxu0 %v1496_v19  ;;  %v1072_v19 = vld [vmem:[%s2901_s7 + $0x88] sm:$0xff] }
 0x15e   :  { %v1569_v20 = vpack.c.bf16 %v1072_v19, %v1071_v18 }
 0x160   :  { %1499 = vmatpush1.bf16.msra.mxu0 %v1498_v23  ;;  %v1572_v23 = vpack.c.bf16 %v1074_v22, %v1073_v21 }
 0x161   :  { %1501 = vmatprep.subr.bf16.mxu0 %v1500_v30 }
 0x164   :  { %1503 = vmatpush1.bf16.msra.mxu0 %v1502_v35 }
 0x1fa   :  { %v640_v46 = vpop.f32.mrb[2].mxu0  ;;  %v782_v47 = vpop.f32.mrb[2].mxu1 }
 0x1fb   :  { %v1574_v48 = vadd.f32 %v640_v46, %v482_v42  ;;  %v1576_v49 = vadd.f32 %v782_v47, %v490_v43  ;;  %v642_v50 = vpop.f32.mrb[3].mxu0  ;;  %v784_v51 = vpop.f32.mrb[3].mxu1 }
 0x1fc   :  { %v1575_v39 = vadd.f32 %v642_v50, %v486_v44  ;;  %v1577_v54 = vadd.f32 %v784_v51, %v494_v45 }
 0x1fd   :  { %v787_v56 = vmax.f32 %v1574_v48, 0.0  ;;  %v789_v61 = vmax.f32 %v1576_v49, 0.0 }
 0x1fe   :  { %v788_v55 = vmax.f32 %v1575_v39, 0.0  ;;  %v790_v57 = vmax.f32 %v1577_v54, 0.0 }
 0x200   :  { %975 = vmatprep.mubr.f32.mxu0 %v788_v55  ;;  %1165 = vmatprep.mubr.msk.f32.mxu1 %vm907_vm2, %v790_v57 }
 0x201   :  { %976 = vmatmul.mubr.f32.vlgmr.msra.gmra.mrb[4].mxu0 %v787_v56  ;;  %1047 = vmatmul.mubr.f32.vlgmr.msra.gmra.mrb[4].mxu1 %v789_v61 }
 0x202   :  { %1546 = vmatpush1.bf16.msra.mxu1 %v1545_v2 }
 0x203   :  { %1547 = vmatprep.subr.bf16.mxu1 %v1589_v40 }
 0x206   :  { %1549 = vmatpush1.bf16.msra.mxu1 %v1548_v63 }
 0x207   :  { %1550 = vmatprep.subr.bf16.mxu1 %v1589_v40 }
 0x20a   :  { %1552 = vmatpush1.bf16.msra.mxu1 %v1551_v3 }
 0x20b   :  { %1553 = vmatprep.subr.bf16.mxu1 %v1589_v40 }
 0x20e   :  { %1555 = vmatpush1.bf16.msra.mxu1 %v1554_v6 }
 0x20f   :  { %1556 = vmatprep.subr.bf16.mxu1 %v1589_v40 }
 0x212   :  { %1558 = vmatpush1.bf16.msra.mxu1 %v1557_v9 }
 0x213   :  { %1559 = vmatprep.subr.bf16.mxu1 %v1589_v40 }
 0x216   :  { %1561 = vmatpush1.bf16.msra.mxu1 %v1560_v11 }
 0x217   :  { %1562 = vmatprep.subr.bf16.mxu1 %v1589_v40 }
 0x21a   :  { %1564 = vmatpush1.bf16.msra.mxu1 %v1563_v14 }
 0x21b   :  { %1565 = vmatprep.subr.bf16.mxu1 %v1589_v40 }
 0x21e   :  { %1567 = vmatpush1.bf16.msra.mxu1 %v1566_v17 }
 0x21f   :  { %1568 = vmatprep.subr.bf16.mxu1 %v1589_v40 }
 0x222   :  { %1570 = vmatpush1.bf16.msra.mxu1 %v1569_v20 }
 0x223   :  { %1571 = vmatprep.subr.bf16.mxu1 %v1589_v40 }
 0x226   :  { %1573 = vmatpush1.bf16.msra.mxu1 %v1572_v23 }
 0x2d4   :  { %v977_v28 = vpop.f32.mrb[4].mxu0  ;;  %v1048_v29 = vpop.f32.mrb[4].mxu1 }
 0x2d5   :  { %v978_v30 = vadd.f32 %v977_v28, %v900_v25  ;;  %v979_v31 = vpop.f32.mrb[5].mxu0  ;;  %v1050_v32 = vpop.f32.mrb[5].mxu1 }
 0x2d6   :  { %v980_v33 = vadd.f32 %v979_v31, %v904_v26 }
 0x2d7   :  { %v1049_v34 = vadd.f32 %v1048_v29, %v978_v30 }
 0x2d8   :  { %v1051_v35 = vadd.f32 %v1050_v32, %v980_v33 }
 0x2d9   :  { %v1053_v37 = vmax.f32 %v1049_v34, 0.0 }
 0x2da   :  { %v1054_v36 = vmax.f32 %v1051_v35, 0.0 }
 0x2dc   :  { %1167 = vmatprep.mubr.msk.f32.mxu1 %vm907_vm2, %v1054_v36 }
 0x2dd   :  { %1150 = vmatmul.mubr.f32.vlgmr.msra.gmra.mrb[6].mxu1 %v1053_v37 }
 0x3b0   :  { %v1151_v58 = vpop.f32.mrb[6].mxu1 }
 0x3b1   :  { %v1152_v60 = vadd.f32 %v1166_v38, %v1151_v58  ;;  %v1153_v40 = vpop.f32.mrb[7].mxu1 }
 0x3b3   :  { %1156 = vst.msk [vmem:[%s2904_s9] sm:$0xff] %vm1155_vm3, %v1152_v60 }

</bundles_post_ra>
